<compile_context>
chip_gen: v7x
topology: tpu7x:2x2x1
jax: 0.10.0
libtpu: 0.0.40
codegen_flags: <defaults>
</compile_context>

<pallas_src>
import math
import functools

import jax
import jax.numpy as jnp
from jax import lax
from jax.experimental import pallas as pl
from jax.experimental.pallas import tpu as pltpu

# ----------------------------- model config ---------------------------------
MAP_SIZE = 8                        # spatial size (H = W = map_size)
CODE_MAP_F_DIM = 32                 # channel / hidden dim
N_HEADS = 4
HEAD_DIM = CODE_MAP_F_DIM // N_HEADS
SEQ = MAP_SIZE * MAP_SIZE           # S = 64
BATCH = 2


# ------------------------------ Pallas kernel --------------------------------
def _attn_kernel(x_ref, posqkv_ref, wqkv_ref, wo_ref, bo_ref, out_ref, *, nb):
    """Fused position-add + multi-head self-attention.

    x_ref:      (nb*S, C) f32   image features, already (S, C) row-major per batch
    posqkv_ref: (S, 3C)   f32   precomputed  pos @ W_qkv + b_qkv  (scale folded in)
    wqkv_ref:   (C, 3C)   bf16  fused Q|K|V weights (q part pre-scaled by 1/sqrt(Dh))
    wo_ref:     (C, C)    bf16  output projection weights
    bo_ref:     (1, C)    f32   output projection bias
    out_ref:    (nb*S, C) f32
    """
    C, S, Dh, H = CODE_MAP_F_DIM, SEQ, HEAD_DIM, N_HEADS

    wqkv = wqkv_ref[...]                                        # (C, 3C) bf16
    posqkv = posqkv_ref[...]                                    # (S, 3C) f32
    col = lax.broadcasted_iota(jnp.int32, (S, C), 1)            # head-column ids

    ctx_parts = []
    for bi in range(nb):                                        # static unroll
        x = x_ref[bi * S:(bi + 1) * S, :].astype(jnp.bfloat16)  # (S, C)
        # single bf16 MXU pass; position-embedding contribution is a f32 bias add
        qkv = jnp.dot(x, wqkv, preferred_element_type=jnp.float32) + posqkv

        # 32-lane slabs (never 8-lane extracts); q already carries 1/sqrt(Dh)
        q = qkv[:, :C].astype(jnp.bfloat16)
        k = qkv[:, C:2 * C].astype(jnp.bfloat16)
        v = qkv[:, 2 * C:].astype(jnp.bfloat16)

        ctx = jnp.zeros((S, C), jnp.float32)
        for h in range(H):                                      # static unroll
            hmask = (col >= h * Dh) & (col < (h + 1) * Dh)      # (S, C) bool
            qh = jnp.where(hmask, q, 0)                         # VPU select, bf16
            # masked-q full-C contraction == q_h @ k_h^T (other dims are zeroed)
            s = lax.dot_general(qh, k, (((1,), (1,)), ((), ())),
                                preferred_element_type=jnp.float32)     # (S, S)
            s = s - jnp.max(s, axis=-1, keepdims=True)
            p = jnp.exp(s)
            p = p * pl.reciprocal(jnp.sum(p, axis=-1, keepdims=True),
                                  approx=True)                  # EUP vrcp
            vh = jnp.where(hmask, v, 0)                         # VPU select, bf16
            # lands head h's context in its own lane columns; accumulate full-lane
            ctx = ctx + jnp.dot(p.astype(jnp.bfloat16), vh,
                                preferred_element_type=jnp.float32)     # (S, C)
        ctx_parts.append(ctx)

    ctx_all = ctx_parts[0] if nb == 1 else jnp.concatenate(ctx_parts, axis=0)
    # ONE well-shaped out-projection matmul for all batches in this step
    out = jnp.dot(ctx_all.astype(jnp.bfloat16), wo_ref[...],
                  preferred_element_type=jnp.float32) + bo_ref[...]
    out_ref[...] = out.astype(out_ref.dtype)


# ------------------------------ wrapper ---------------------------------------
@functools.partial(jax.jit, static_argnames=("batch_grid",))
def img_feat_to_grid_forward(img, kparams, *, batch_grid=False):
    """img: (bs, C, H, W) float32 (NCHW, like the PyTorch module).
       Returns grid_feat: (bs, S, C) float32.

       batch_grid=False : single grid step, batches folded along M (best v5e/v6e).
       batch_grid=True  : grid=(bs,), "parallel" batch axis (v7x: one batch per TC).
    """
    bs, C, H, W = img.shape
    assert C == CODE_MAP_F_DIM and H == MAP_SIZE and W == MAP_SIZE
    S = H * W

    # glue: view(bs, C, -1).transpose(-1, -2) -> (bs, S, C) -> stack batch on M.
    # allow_input_fusion below lets XLA fold this transpose into the pallas_call.
    x2d = jnp.transpose(img.reshape(bs, C, S), (0, 2, 1)).reshape(bs * S, C)
    x2d = x2d.astype(jnp.float32)

    pos_qkv, w_qkv, w_o, b_o = kparams

    def rep(shape):                        # replicated (same block every step)
        return pl.BlockSpec(shape, lambda *_: (0,) * len(shape))

    if batch_grid:
        nb, grid = 1, (bs,)
        x_spec = pl.BlockSpec((S, C), lambda b: (b, 0))
        out_spec = pl.BlockSpec((S, C), lambda b: (b, 0))
        dims = ("parallel",)               # v7x: one batch per TensorCore
    else:
        nb, grid = bs, (1,)
        x_spec = pl.BlockSpec((bs * S, C), lambda *_: (0, 0))
        out_spec = pl.BlockSpec((bs * S, C), lambda *_: (0, 0))
        dims = ("arbitrary",)

    out2d = pl.pallas_call(
        functools.partial(_attn_kernel, nb=nb),
        out_shape=jax.ShapeDtypeStruct((bs * S, C), jnp.float32),
        grid=grid,
        in_specs=[
            x_spec,                        # x        (bs*S, C) or (S, C)
            rep((S, 3 * C)),               # pos_qkv  (64, 96)  f32
            rep((C, 3 * C)),               # W_qkv    (32, 96)  bf16
            rep((C, C)),                   # W_o      (32, 32)  bf16
            rep((1, C)),                   # b_o      (1, 32)   f32
        ],
        out_specs=out_spec,
        compiler_params=pltpu.CompilerParams(
            dimension_semantics=dims,
            allow_input_fusion=[True, False, False, False, False]),
    )(x2d, pos_qkv, w_qkv, w_o, b_o)

    # row-major reshape back to (bs, S, C) -- same bytes, free
    return out2d.reshape(bs, S, C)


# -------------------------- deterministic params -----------------------------
def init_params(key):
    """Raw (PyTorch-layout-equivalent) parameters, all f32."""
    C, S = CODE_MAP_F_DIM, SEQ
    ks = jax.random.split(key, 9)
    lin = 1.0 / math.sqrt(C)

    def u(k, shape):
        return jax.random.uniform(k, shape, jnp.float32, -lin, lin)

    return dict(
        pos=jax.random.normal(ks[0], (S, C), jnp.float32),   # nn.Embedding table
        wq=u(ks[1], (C, C)), bq=u(ks[2], (1, C)),
        wk=u(ks[3], (C, C)), bk=u(ks[4], (1, C)),
        wv=u(ks[5], (C, C)), bv=u(ks[6], (1, C)),
        wo=u(ks[7], (C, C)), bo=u(ks[8], (1, C)),
    )


def pack_params(p):
    """Kernel-side params: fused/scaled QKV weights (bf16), precomputed
    pos @ W_qkv + b_qkv bias (f32), bf16 out-proj weights, f32 out bias."""
    scale = 1.0 / math.sqrt(HEAD_DIM)
    w_qkv = jnp.concatenate([p["wq"] * scale, p["wk"], p["wv"]], axis=1)   # (C, 3C)
    b_qkv = jnp.concatenate([p["bq"] * scale, p["bk"], p["bv"]], axis=1)   # (1, 3C)
    pos_qkv = p["pos"] @ w_qkv + b_qkv                                     # (S, 3C) f32
    return (pos_qkv,
            w_qkv.astype(jnp.bfloat16),
            p["wo"].astype(jnp.bfloat16),
            p["bo"])


# ------------------------------ reference (pure JAX, f32) ---------------------
def _reference(img, p):
    C = CODE_MAP_F_DIM
    bs, _, H, W = img.shape
    S = H * W
    x = jnp.transpose(img.reshape(bs, C, S), (0, 2, 1)) + p["pos"][None]
    q = x @ p["wq"] + p["bq"]
    k = x @ p["wk"] + p["bk"]
    v = x @ p["wv"] + p["bv"]
    qh = q.reshape(bs, S, N_HEADS, HEAD_DIM).transpose(0, 2, 1, 3)
    kh = k.reshape(bs, S, N_HEADS, HEAD_DIM).transpose(0, 2, 1, 3)
    vh = v.reshape(bs, S, N_HEADS, HEAD_DIM).transpose(0, 2, 1, 3)
    s = jnp.einsum("bhqd,bhkd->bhqk", qh, kh) / math.sqrt(HEAD_DIM)
    prob = jax.nn.softmax(s, axis=-1)
    ctx = jnp.einsum("bhqk,bhkd->bhqd", prob, vh).transpose(0, 2, 1, 3)
    ctx = ctx.reshape(bs, S, C)
    return ctx @ p["wo"] + p["bo"]


# ---------------------------------- main --------------------------------------
if __name__ == "__main__":
    key = jax.random.PRNGKey(0)
    k_img, k_param = jax.random.split(key)

    img = jax.random.normal(k_img, (BATCH, CODE_MAP_F_DIM, MAP_SIZE, MAP_SIZE),
                            jnp.float32)
    raw_params = init_params(k_param)
    kparams = pack_params(raw_params)
    ref = _reference(img, raw_params)

    # default layout: single grid step (v5e / v6e)
    out = jax.block_until_ready(img_feat_to_grid_forward(img, kparams))
    assert out.shape == (BATCH, SEQ, CODE_MAP_F_DIM)
    # tolerance budget: bf16 MXU operands (f32 accumulation) + approx reciprocal
    assert jnp.allclose(out, ref, atol=3e-2, rtol=3e-2)

    # batch-grid layout: one batch per grid step / per TensorCore on v7x
    out_bg = jax.block_until_ready(
        img_feat_to_grid_forward(img, kparams, batch_grid=True))
    assert out_bg.shape == (BATCH, SEQ, CODE_MAP_F_DIM)
    assert jnp.allclose(out_bg, ref, atol=3e-2, rtol=3e-2)

    print("KERNEL_OK")
</pallas_src>

<mosaic_0001>
module attributes {stable_mosaic.version = 11 : i64} {
  func.func @_attn_kernel(%arg0: i32, %arg1: memref<128x32xf32, #tpu.memory_space<vmem>>, %arg2: memref<64x96xf32, #tpu.memory_space<vmem>>, %arg3: memref<32x96xbf16, #tpu.memory_space<vmem>>, %arg4: memref<32x32xbf16, #tpu.memory_space<vmem>>, %arg5: memref<1x32xf32, #tpu.memory_space<vmem>>, %arg6: memref<128x32xf32, #tpu.memory_space<vmem>>) attributes {dimension_semantics = [#tpu.dimension_semantics<arbitrary>], iteration_bounds = array<i64: 1>, scalar_prefetch = 0 : i64, scratch_operands = 0 : i64, tpu.core_type = #tpu.core_type<tc>, window_params = [{pipeline_mode = #tpu.pipeline_mode<synchronous>, transform_indices = @transform_0, window_bounds = array<i64: 128, 32>}, {pipeline_mode = #tpu.pipeline_mode<synchronous>, transform_indices = @transform_1, window_bounds = array<i64: 64, 96>}, {pipeline_mode = #tpu.pipeline_mode<synchronous>, transform_indices = @transform_2, window_bounds = array<i64: 32, 96>}, {pipeline_mode = #tpu.pipeline_mode<synchronous>, transform_indices = @transform_3, window_bounds = array<i64: 32, 32>}, {pipeline_mode = #tpu.pipeline_mode<synchronous>, transform_indices = @transform_4, window_bounds = array<i64: 1, 32>}, {pipeline_mode = #tpu.pipeline_mode<synchronous>, transform_indices = @transform_5, window_bounds = array<i64: 128, 32>}]} {
    %c0 = arith.constant 0 : index
    %c0_0 = arith.constant 0 : index
    %0 = vector.load %arg3[%c0, %c0_0] : memref<32x96xbf16, #tpu.memory_space<vmem>>, vector<32x96xbf16>
    %c0_1 = arith.constant 0 : index
    %c0_2 = arith.constant 0 : index
    %1 = vector.load %arg2[%c0_1, %c0_2] : memref<64x96xf32, #tpu.memory_space<vmem>>, vector<64x96xf32>
    %2 = tpu.iota {dimensions = array<i32: 1>} : vector<64x32xi32>
    %c0_3 = arith.constant 0 : index
    %c0_4 = arith.constant 0 : index
    %3 = vector.load %arg1[%c0_3, %c0_4] : memref<128x32xf32, #tpu.memory_space<vmem>>, vector<64x32xf32>
    %4 = arith.truncf %3 : vector<64x32xf32> to vector<64x32xbf16>
    %cst = arith.constant dense<0.000000e+00> : vector<64x96xf32>
    %5 = tpu.matmul %4, %0, %cst {dimension_numbers = #tpu.dot_dimension_numbers<[1], [0], [0], [1], [0, 0, 1, 1], [], []>} : vector<64x32xbf16>, vector<32x96xbf16>, vector<64x96xf32> -> vector<64x96xf32>
    %6 = arith.addf %5, %1 : vector<64x96xf32>
    %7 = vector.extract_strided_slice %6 {offsets = [0, 0], sizes = [64, 32], strides = [1, 1]} : vector<64x96xf32> to vector<64x32xf32>
    %8 = arith.truncf %7 : vector<64x32xf32> to vector<64x32xbf16>
    %9 = vector.extract_strided_slice %6 {offsets = [0, 32], sizes = [64, 32], strides = [1, 1]} : vector<64x96xf32> to vector<64x32xf32>
    %10 = arith.truncf %9 : vector<64x32xf32> to vector<64x32xbf16>
    %11 = vector.extract_strided_slice %6 {offsets = [0, 64], sizes = [64, 32], strides = [1, 1]} : vector<64x96xf32> to vector<64x32xf32>
    %12 = arith.truncf %11 : vector<64x32xf32> to vector<64x32xbf16>
    %cst_5 = arith.constant 0.000000e+00 : f32
    %13 = vector.broadcast %cst_5 : f32 to vector<64x32xf32>
    %c0_i32 = arith.constant 0 : i32
    %14 = vector.broadcast %c0_i32 : i32 to vector<64x32xi32>
    %15 = arith.cmpi sge, %2, %14 : vector<64x32xi32>
    %c8_i32 = arith.constant 8 : i32
    %16 = vector.broadcast %c8_i32 : i32 to vector<64x32xi32>
    %17 = arith.cmpi slt, %2, %16 : vector<64x32xi32>
    %18 = arith.andi %15, %17 : vector<64x32xi1>
    %c0_i32_6 = arith.constant 0 : i32
    %19 = arith.sitofp %c0_i32_6 : i32 to bf16
    %20 = vector.broadcast %19 : bf16 to vector<64x32xbf16>
    %21 = arith.select %18, %8, %20 : vector<64x32xi1>, vector<64x32xbf16>
    %cst_7 = arith.constant dense<0.000000e+00> : vector<64x64xf32>
    %22 = tpu.matmul %21, %10, %cst_7 {dimension_numbers = #tpu.dot_dimension_numbers<[1], [1], [0], [0], [0, 0, 1, 0], [], []>} : vector<64x32xbf16>, vector<64x32xbf16>, vector<64x64xf32> -> vector<64x64xf32>
    %cst_8 = arith.constant dense<0xFF800000> : vector<64xf32>
    %23 = vector.multi_reduction <maximumf>, %22, %cst_8 [1] : vector<64x64xf32> to vector<64xf32>
    %24 = vector.shape_cast %23 : vector<64xf32> to vector<64x1xf32>
    %25 = vector.broadcast %24 : vector<64x1xf32> to vector<64x64xf32>
    %26 = arith.subf %22, %25 : vector<64x64xf32>
    %27 = math.exp %26 : vector<64x64xf32>
    %cst_9 = arith.constant dense<0.000000e+00> : vector<64xf32>
    %28 = vector.multi_reduction <add>, %27, %cst_9 [1] : vector<64x64xf32> to vector<64xf32>
    %29 = vector.shape_cast %28 : vector<64xf32> to vector<64x1xf32>
    %30 = tpu.reciprocal %29 {approx = true} : vector<64x1xf32> -> vector<64x1xf32>
    %31 = vector.broadcast %30 : vector<64x1xf32> to vector<64x64xf32>
    %32 = arith.mulf %27, %31 : vector<64x64xf32>
    %c0_i32_10 = arith.constant 0 : i32
    %33 = arith.sitofp %c0_i32_10 : i32 to bf16
    %34 = vector.broadcast %33 : bf16 to vector<64x32xbf16>
    %35 = arith.select %18, %12, %34 : vector<64x32xi1>, vector<64x32xbf16>
    %36 = arith.truncf %32 : vector<64x64xf32> to vector<64x64xbf16>
    %cst_11 = arith.constant dense<0.000000e+00> : vector<64x32xf32>
    %37 = tpu.matmul %36, %35, %cst_11 {dimension_numbers = #tpu.dot_dimension_numbers<[1], [0], [0], [1], [0, 0, 1, 1], [], []>} : vector<64x64xbf16>, vector<64x32xbf16>, vector<64x32xf32> -> vector<64x32xf32>
    %38 = arith.addf %13, %37 : vector<64x32xf32>
    %c8_i32_12 = arith.constant 8 : i32
    %39 = vector.broadcast %c8_i32_12 : i32 to vector<64x32xi32>
    %40 = arith.cmpi sge, %2, %39 : vector<64x32xi32>
    %c16_i32 = arith.constant 16 : i32
    %41 = vector.broadcast %c16_i32 : i32 to vector<64x32xi32>
    %42 = arith.cmpi slt, %2, %41 : vector<64x32xi32>
    %43 = arith.andi %40, %42 : vector<64x32xi1>
    %c0_i32_13 = arith.constant 0 : i32
    %44 = arith.sitofp %c0_i32_13 : i32 to bf16
    %45 = vector.broadcast %44 : bf16 to vector<64x32xbf16>
    %46 = arith.select %43, %8, %45 : vector<64x32xi1>, vector<64x32xbf16>
    %cst_14 = arith.constant dense<0.000000e+00> : vector<64x64xf32>
    %47 = tpu.matmul %46, %10, %cst_14 {dimension_numbers = #tpu.dot_dimension_numbers<[1], [1], [0], [0], [0, 0, 1, 0], [], []>} : vector<64x32xbf16>, vector<64x32xbf16>, vector<64x64xf32> -> vector<64x64xf32>
    %cst_15 = arith.constant dense<0xFF800000> : vector<64xf32>
    %48 = vector.multi_reduction <maximumf>, %47, %cst_15 [1] : vector<64x64xf32> to vector<64xf32>
    %49 = vector.shape_cast %48 : vector<64xf32> to vector<64x1xf32>
    %50 = vector.broadcast %49 : vector<64x1xf32> to vector<64x64xf32>
    %51 = arith.subf %47, %50 : vector<64x64xf32>
    %52 = math.exp %51 : vector<64x64xf32>
    %cst_16 = arith.constant dense<0.000000e+00> : vector<64xf32>
    %53 = vector.multi_reduction <add>, %52, %cst_16 [1] : vector<64x64xf32> to vector<64xf32>
    %54 = vector.shape_cast %53 : vector<64xf32> to vector<64x1xf32>
    %55 = tpu.reciprocal %54 {approx = true} : vector<64x1xf32> -> vector<64x1xf32>
    %56 = vector.broadcast %55 : vector<64x1xf32> to vector<64x64xf32>
    %57 = arith.mulf %52, %56 : vector<64x64xf32>
    %c0_i32_17 = arith.constant 0 : i32
    %58 = arith.sitofp %c0_i32_17 : i32 to bf16
    %59 = vector.broadcast %58 : bf16 to vector<64x32xbf16>
    %60 = arith.select %43, %12, %59 : vector<64x32xi1>, vector<64x32xbf16>
    %61 = arith.truncf %57 : vector<64x64xf32> to vector<64x64xbf16>
    %cst_18 = arith.constant dense<0.000000e+00> : vector<64x32xf32>
    %62 = tpu.matmul %61, %60, %cst_18 {dimension_numbers = #tpu.dot_dimension_numbers<[1], [0], [0], [1], [0, 0, 1, 1], [], []>} : vector<64x64xbf16>, vector<64x32xbf16>, vector<64x32xf32> -> vector<64x32xf32>
    %63 = arith.addf %38, %62 : vector<64x32xf32>
    %c16_i32_19 = arith.constant 16 : i32
    %64 = vector.broadcast %c16_i32_19 : i32 to vector<64x32xi32>
    %65 = arith.cmpi sge, %2, %64 : vector<64x32xi32>
    %c24_i32 = arith.constant 24 : i32
    %66 = vector.broadcast %c24_i32 : i32 to vector<64x32xi32>
    %67 = arith.cmpi slt, %2, %66 : vector<64x32xi32>
    %68 = arith.andi %65, %67 : vector<64x32xi1>
    %c0_i32_20 = arith.constant 0 : i32
    %69 = arith.sitofp %c0_i32_20 : i32 to bf16
    %70 = vector.broadcast %69 : bf16 to vector<64x32xbf16>
    %71 = arith.select %68, %8, %70 : vector<64x32xi1>, vector<64x32xbf16>
    %cst_21 = arith.constant dense<0.000000e+00> : vector<64x64xf32>
    %72 = tpu.matmul %71, %10, %cst_21 {dimension_numbers = #tpu.dot_dimension_numbers<[1], [1], [0], [0], [0, 0, 1, 0], [], []>} : vector<64x32xbf16>, vector<64x32xbf16>, vector<64x64xf32> -> vector<64x64xf32>
    %cst_22 = arith.constant dense<0xFF800000> : vector<64xf32>
    %73 = vector.multi_reduction <maximumf>, %72, %cst_22 [1] : vector<64x64xf32> to vector<64xf32>
    %74 = vector.shape_cast %73 : vector<64xf32> to vector<64x1xf32>
    %75 = vector.broadcast %74 : vector<64x1xf32> to vector<64x64xf32>
    %76 = arith.subf %72, %75 : vector<64x64xf32>
    %77 = math.exp %76 : vector<64x64xf32>
    %cst_23 = arith.constant dense<0.000000e+00> : vector<64xf32>
    %78 = vector.multi_reduction <add>, %77, %cst_23 [1] : vector<64x64xf32> to vector<64xf32>
    %79 = vector.shape_cast %78 : vector<64xf32> to vector<64x1xf32>
    %80 = tpu.reciprocal %79 {approx = true} : vector<64x1xf32> -> vector<64x1xf32>
    %81 = vector.broadcast %80 : vector<64x1xf32> to vector<64x64xf32>
    %82 = arith.mulf %77, %81 : vector<64x64xf32>
    %c0_i32_24 = arith.constant 0 : i32
    %83 = arith.sitofp %c0_i32_24 : i32 to bf16
    %84 = vector.broadcast %83 : bf16 to vector<64x32xbf16>
    %85 = arith.select %68, %12, %84 : vector<64x32xi1>, vector<64x32xbf16>
    %86 = arith.truncf %82 : vector<64x64xf32> to vector<64x64xbf16>
    %cst_25 = arith.constant dense<0.000000e+00> : vector<64x32xf32>
    %87 = tpu.matmul %86, %85, %cst_25 {dimension_numbers = #tpu.dot_dimension_numbers<[1], [0], [0], [1], [0, 0, 1, 1], [], []>} : vector<64x64xbf16>, vector<64x32xbf16>, vector<64x32xf32> -> vector<64x32xf32>
    %88 = arith.addf %63, %87 : vector<64x32xf32>
    %c24_i32_26 = arith.constant 24 : i32
    %89 = vector.broadcast %c24_i32_26 : i32 to vector<64x32xi32>
    %90 = arith.cmpi sge, %2, %89 : vector<64x32xi32>
    %c32_i32 = arith.constant 32 : i32
    %91 = vector.broadcast %c32_i32 : i32 to vector<64x32xi32>
    %92 = arith.cmpi slt, %2, %91 : vector<64x32xi32>
    %93 = arith.andi %90, %92 : vector<64x32xi1>
    %c0_i32_27 = arith.constant 0 : i32
    %94 = arith.sitofp %c0_i32_27 : i32 to bf16
    %95 = vector.broadcast %94 : bf16 to vector<64x32xbf16>
    %96 = arith.select %93, %8, %95 : vector<64x32xi1>, vector<64x32xbf16>
    %cst_28 = arith.constant dense<0.000000e+00> : vector<64x64xf32>
    %97 = tpu.matmul %96, %10, %cst_28 {dimension_numbers = #tpu.dot_dimension_numbers<[1], [1], [0], [0], [0, 0, 1, 0], [], []>} : vector<64x32xbf16>, vector<64x32xbf16>, vector<64x64xf32> -> vector<64x64xf32>
    %cst_29 = arith.constant dense<0xFF800000> : vector<64xf32>
    %98 = vector.multi_reduction <maximumf>, %97, %cst_29 [1] : vector<64x64xf32> to vector<64xf32>
    %99 = vector.shape_cast %98 : vector<64xf32> to vector<64x1xf32>
    %100 = vector.broadcast %99 : vector<64x1xf32> to vector<64x64xf32>
    %101 = arith.subf %97, %100 : vector<64x64xf32>
    %102 = math.exp %101 : vector<64x64xf32>
    %cst_30 = arith.constant dense<0.000000e+00> : vector<64xf32>
    %103 = vector.multi_reduction <add>, %102, %cst_30 [1] : vector<64x64xf32> to vector<64xf32>
    %104 = vector.shape_cast %103 : vector<64xf32> to vector<64x1xf32>
    %105 = tpu.reciprocal %104 {approx = true} : vector<64x1xf32> -> vector<64x1xf32>
    %106 = vector.broadcast %105 : vector<64x1xf32> to vector<64x64xf32>
    %107 = arith.mulf %102, %106 : vector<64x64xf32>
    %c0_i32_31 = arith.constant 0 : i32
    %108 = arith.sitofp %c0_i32_31 : i32 to bf16
    %109 = vector.broadcast %108 : bf16 to vector<64x32xbf16>
    %110 = arith.select %93, %12, %109 : vector<64x32xi1>, vector<64x32xbf16>
    %111 = arith.truncf %107 : vector<64x64xf32> to vector<64x64xbf16>
    %cst_32 = arith.constant dense<0.000000e+00> : vector<64x32xf32>
    %112 = tpu.matmul %111, %110, %cst_32 {dimension_numbers = #tpu.dot_dimension_numbers<[1], [0], [0], [1], [0, 0, 1, 1], [], []>} : vector<64x64xbf16>, vector<64x32xbf16>, vector<64x32xf32> -> vector<64x32xf32>
    %113 = arith.addf %88, %112 : vector<64x32xf32>
    %c64 = arith.constant 64 : index
    %c0_33 = arith.constant 0 : index
    %114 = vector.load %arg1[%c64, %c0_33] : memref<128x32xf32, #tpu.memory_space<vmem>>, vector<64x32xf32>
    %115 = arith.truncf %114 : vector<64x32xf32> to vector<64x32xbf16>
    %cst_34 = arith.constant dense<0.000000e+00> : vector<64x96xf32>
    %116 = tpu.matmul %115, %0, %cst_34 {dimension_numbers = #tpu.dot_dimension_numbers<[1], [0], [0], [1], [0, 0, 1, 1], [], []>} : vector<64x32xbf16>, vector<32x96xbf16>, vector<64x96xf32> -> vector<64x96xf32>
    %117 = arith.addf %116, %1 : vector<64x96xf32>
    %118 = vector.extract_strided_slice %117 {offsets = [0, 0], sizes = [64, 32], strides = [1, 1]} : vector<64x96xf32> to vector<64x32xf32>
    %119 = arith.truncf %118 : vector<64x32xf32> to vector<64x32xbf16>
    %120 = vector.extract_strided_slice %117 {offsets = [0, 32], sizes = [64, 32], strides = [1, 1]} : vector<64x96xf32> to vector<64x32xf32>
    %121 = arith.truncf %120 : vector<64x32xf32> to vector<64x32xbf16>
    %122 = vector.extract_strided_slice %117 {offsets = [0, 64], sizes = [64, 32], strides = [1, 1]} : vector<64x96xf32> to vector<64x32xf32>
    %123 = arith.truncf %122 : vector<64x32xf32> to vector<64x32xbf16>
    %cst_35 = arith.constant 0.000000e+00 : f32
    %124 = vector.broadcast %cst_35 : f32 to vector<64x32xf32>
    %c0_i32_36 = arith.constant 0 : i32
    %125 = vector.broadcast %c0_i32_36 : i32 to vector<64x32xi32>
    %126 = arith.cmpi sge, %2, %125 : vector<64x32xi32>
    %c8_i32_37 = arith.constant 8 : i32
    %127 = vector.broadcast %c8_i32_37 : i32 to vector<64x32xi32>
    %128 = arith.cmpi slt, %2, %127 : vector<64x32xi32>
    %129 = arith.andi %126, %128 : vector<64x32xi1>
    %c0_i32_38 = arith.constant 0 : i32
    %130 = arith.sitofp %c0_i32_38 : i32 to bf16
    %131 = vector.broadcast %130 : bf16 to vector<64x32xbf16>
    %132 = arith.select %129, %119, %131 : vector<64x32xi1>, vector<64x32xbf16>
    %cst_39 = arith.constant dense<0.000000e+00> : vector<64x64xf32>
    %133 = tpu.matmul %132, %121, %cst_39 {dimension_numbers = #tpu.dot_dimension_numbers<[1], [1], [0], [0], [0, 0, 1, 0], [], []>} : vector<64x32xbf16>, vector<64x32xbf16>, vector<64x64xf32> -> vector<64x64xf32>
    %cst_40 = arith.constant dense<0xFF800000> : vector<64xf32>
    %134 = vector.multi_reduction <maximumf>, %133, %cst_40 [1] : vector<64x64xf32> to vector<64xf32>
    %135 = vector.shape_cast %134 : vector<64xf32> to vector<64x1xf32>
    %136 = vector.broadcast %135 : vector<64x1xf32> to vector<64x64xf32>
    %137 = arith.subf %133, %136 : vector<64x64xf32>
    %138 = math.exp %137 : vector<64x64xf32>
    %cst_41 = arith.constant dense<0.000000e+00> : vector<64xf32>
    %139 = vector.multi_reduction <add>, %138, %cst_41 [1] : vector<64x64xf32> to vector<64xf32>
    %140 = vector.shape_cast %139 : vector<64xf32> to vector<64x1xf32>
    %141 = tpu.reciprocal %140 {approx = true} : vector<64x1xf32> -> vector<64x1xf32>
    %142 = vector.broadcast %141 : vector<64x1xf32> to vector<64x64xf32>
    %143 = arith.mulf %138, %142 : vector<64x64xf32>
    %c0_i32_42 = arith.constant 0 : i32
    %144 = arith.sitofp %c0_i32_42 : i32 to bf16
    %145 = vector.broadcast %144 : bf16 to vector<64x32xbf16>
    %146 = arith.select %129, %123, %145 : vector<64x32xi1>, vector<64x32xbf16>
    %147 = arith.truncf %143 : vector<64x64xf32> to vector<64x64xbf16>
    %cst_43 = arith.constant dense<0.000000e+00> : vector<64x32xf32>
    %148 = tpu.matmul %147, %146, %cst_43 {dimension_numbers = #tpu.dot_dimension_numbers<[1], [0], [0], [1], [0, 0, 1, 1], [], []>} : vector<64x64xbf16>, vector<64x32xbf16>, vector<64x32xf32> -> vector<64x32xf32>
    %149 = arith.addf %124, %148 : vector<64x32xf32>
    %c8_i32_44 = arith.constant 8 : i32
    %150 = vector.broadcast %c8_i32_44 : i32 to vector<64x32xi32>
    %151 = arith.cmpi sge, %2, %150 : vector<64x32xi32>
    %c16_i32_45 = arith.constant 16 : i32
    %152 = vector.broadcast %c16_i32_45 : i32 to vector<64x32xi32>
    %153 = arith.cmpi slt, %2, %152 : vector<64x32xi32>
    %154 = arith.andi %151, %153 : vector<64x32xi1>
    %c0_i32_46 = arith.constant 0 : i32
    %155 = arith.sitofp %c0_i32_46 : i32 to bf16
    %156 = vector.broadcast %155 : bf16 to vector<64x32xbf16>
    %157 = arith.select %154, %119, %156 : vector<64x32xi1>, vector<64x32xbf16>
    %cst_47 = arith.constant dense<0.000000e+00> : vector<64x64xf32>
    %158 = tpu.matmul %157, %121, %cst_47 {dimension_numbers = #tpu.dot_dimension_numbers<[1], [1], [0], [0], [0, 0, 1, 0], [], []>} : vector<64x32xbf16>, vector<64x32xbf16>, vector<64x64xf32> -> vector<64x64xf32>
    %cst_48 = arith.constant dense<0xFF800000> : vector<64xf32>
    %159 = vector.multi_reduction <maximumf>, %158, %cst_48 [1] : vector<64x64xf32> to vector<64xf32>
    %160 = vector.shape_cast %159 : vector<64xf32> to vector<64x1xf32>
    %161 = vector.broadcast %160 : vector<64x1xf32> to vector<64x64xf32>
    %162 = arith.subf %158, %161 : vector<64x64xf32>
    %163 = math.exp %162 : vector<64x64xf32>
    %cst_49 = arith.constant dense<0.000000e+00> : vector<64xf32>
    %164 = vector.multi_reduction <add>, %163, %cst_49 [1] : vector<64x64xf32> to vector<64xf32>
    %165 = vector.shape_cast %164 : vector<64xf32> to vector<64x1xf32>
    %166 = tpu.reciprocal %165 {approx = true} : vector<64x1xf32> -> vector<64x1xf32>
    %167 = vector.broadcast %166 : vector<64x1xf32> to vector<64x64xf32>
    %168 = arith.mulf %163, %167 : vector<64x64xf32>
    %c0_i32_50 = arith.constant 0 : i32
    %169 = arith.sitofp %c0_i32_50 : i32 to bf16
    %170 = vector.broadcast %169 : bf16 to vector<64x32xbf16>
    %171 = arith.select %154, %123, %170 : vector<64x32xi1>, vector<64x32xbf16>
    %172 = arith.truncf %168 : vector<64x64xf32> to vector<64x64xbf16>
    %cst_51 = arith.constant dense<0.000000e+00> : vector<64x32xf32>
    %173 = tpu.matmul %172, %171, %cst_51 {dimension_numbers = #tpu.dot_dimension_numbers<[1], [0], [0], [1], [0, 0, 1, 1], [], []>} : vector<64x64xbf16>, vector<64x32xbf16>, vector<64x32xf32> -> vector<64x32xf32>
    %174 = arith.addf %149, %173 : vector<64x32xf32>
    %c16_i32_52 = arith.constant 16 : i32
    %175 = vector.broadcast %c16_i32_52 : i32 to vector<64x32xi32>
    %176 = arith.cmpi sge, %2, %175 : vector<64x32xi32>
    %c24_i32_53 = arith.constant 24 : i32
    %177 = vector.broadcast %c24_i32_53 : i32 to vector<64x32xi32>
    %178 = arith.cmpi slt, %2, %177 : vector<64x32xi32>
    %179 = arith.andi %176, %178 : vector<64x32xi1>
    %c0_i32_54 = arith.constant 0 : i32
    %180 = arith.sitofp %c0_i32_54 : i32 to bf16
    %181 = vector.broadcast %180 : bf16 to vector<64x32xbf16>
    %182 = arith.select %179, %119, %181 : vector<64x32xi1>, vector<64x32xbf16>
    %cst_55 = arith.constant dense<0.000000e+00> : vector<64x64xf32>
    %183 = tpu.matmul %182, %121, %cst_55 {dimension_numbers = #tpu.dot_dimension_numbers<[1], [1], [0], [0], [0, 0, 1, 0], [], []>} : vector<64x32xbf16>, vector<64x32xbf16>, vector<64x64xf32> -> vector<64x64xf32>
    %cst_56 = arith.constant dense<0xFF800000> : vector<64xf32>
    %184 = vector.multi_reduction <maximumf>, %183, %cst_56 [1] : vector<64x64xf32> to vector<64xf32>
    %185 = vector.shape_cast %184 : vector<64xf32> to vector<64x1xf32>
    %186 = vector.broadcast %185 : vector<64x1xf32> to vector<64x64xf32>
    %187 = arith.subf %183, %186 : vector<64x64xf32>
    %188 = math.exp %187 : vector<64x64xf32>
    %cst_57 = arith.constant dense<0.000000e+00> : vector<64xf32>
    %189 = vector.multi_reduction <add>, %188, %cst_57 [1] : vector<64x64xf32> to vector<64xf32>
    %190 = vector.shape_cast %189 : vector<64xf32> to vector<64x1xf32>
    %191 = tpu.reciprocal %190 {approx = true} : vector<64x1xf32> -> vector<64x1xf32>
    %192 = vector.broadcast %191 : vector<64x1xf32> to vector<64x64xf32>
    %193 = arith.mulf %188, %192 : vector<64x64xf32>
    %c0_i32_58 = arith.constant 0 : i32
    %194 = arith.sitofp %c0_i32_58 : i32 to bf16
    %195 = vector.broadcast %194 : bf16 to vector<64x32xbf16>
    %196 = arith.select %179, %123, %195 : vector<64x32xi1>, vector<64x32xbf16>
    %197 = arith.truncf %193 : vector<64x64xf32> to vector<64x64xbf16>
    %cst_59 = arith.constant dense<0.000000e+00> : vector<64x32xf32>
    %198 = tpu.matmul %197, %196, %cst_59 {dimension_numbers = #tpu.dot_dimension_numbers<[1], [0], [0], [1], [0, 0, 1, 1], [], []>} : vector<64x64xbf16>, vector<64x32xbf16>, vector<64x32xf32> -> vector<64x32xf32>
    %199 = arith.addf %174, %198 : vector<64x32xf32>
    %c24_i32_60 = arith.constant 24 : i32
    %200 = vector.broadcast %c24_i32_60 : i32 to vector<64x32xi32>
    %201 = arith.cmpi sge, %2, %200 : vector<64x32xi32>
    %c32_i32_61 = arith.constant 32 : i32
    %202 = vector.broadcast %c32_i32_61 : i32 to vector<64x32xi32>
    %203 = arith.cmpi slt, %2, %202 : vector<64x32xi32>
    %204 = arith.andi %201, %203 : vector<64x32xi1>
    %c0_i32_62 = arith.constant 0 : i32
    %205 = arith.sitofp %c0_i32_62 : i32 to bf16
    %206 = vector.broadcast %205 : bf16 to vector<64x32xbf16>
    %207 = arith.select %204, %119, %206 : vector<64x32xi1>, vector<64x32xbf16>
    %cst_63 = arith.constant dense<0.000000e+00> : vector<64x64xf32>
    %208 = tpu.matmul %207, %121, %cst_63 {dimension_numbers = #tpu.dot_dimension_numbers<[1], [1], [0], [0], [0, 0, 1, 0], [], []>} : vector<64x32xbf16>, vector<64x32xbf16>, vector<64x64xf32> -> vector<64x64xf32>
    %cst_64 = arith.constant dense<0xFF800000> : vector<64xf32>
    %209 = vector.multi_reduction <maximumf>, %208, %cst_64 [1] : vector<64x64xf32> to vector<64xf32>
    %210 = vector.shape_cast %209 : vector<64xf32> to vector<64x1xf32>
    %211 = vector.broadcast %210 : vector<64x1xf32> to vector<64x64xf32>
    %212 = arith.subf %208, %211 : vector<64x64xf32>
    %213 = math.exp %212 : vector<64x64xf32>
    %cst_65 = arith.constant dense<0.000000e+00> : vector<64xf32>
    %214 = vector.multi_reduction <add>, %213, %cst_65 [1] : vector<64x64xf32> to vector<64xf32>
    %215 = vector.shape_cast %214 : vector<64xf32> to vector<64x1xf32>
    %216 = tpu.reciprocal %215 {approx = true} : vector<64x1xf32> -> vector<64x1xf32>
    %217 = vector.broadcast %216 : vector<64x1xf32> to vector<64x64xf32>
    %218 = arith.mulf %213, %217 : vector<64x64xf32>
    %c0_i32_66 = arith.constant 0 : i32
    %219 = arith.sitofp %c0_i32_66 : i32 to bf16
    %220 = vector.broadcast %219 : bf16 to vector<64x32xbf16>
    %221 = arith.select %204, %123, %220 : vector<64x32xi1>, vector<64x32xbf16>
    %222 = arith.truncf %218 : vector<64x64xf32> to vector<64x64xbf16>
    %cst_67 = arith.constant dense<0.000000e+00> : vector<64x32xf32>
    %223 = tpu.matmul %222, %221, %cst_67 {dimension_numbers = #tpu.dot_dimension_numbers<[1], [0], [0], [1], [0, 0, 1, 1], [], []>} : vector<64x64xbf16>, vector<64x32xbf16>, vector<64x32xf32> -> vector<64x32xf32>
    %224 = arith.addf %199, %223 : vector<64x32xf32>
    %225 = tpu.concatenate %113, %224 in 0 : vector<64x32xf32>, vector<64x32xf32> -> vector<128x32xf32>
    %226 = arith.truncf %225 : vector<128x32xf32> to vector<128x32xbf16>
    %c0_68 = arith.constant 0 : index
    %c0_69 = arith.constant 0 : index
    %227 = vector.load %arg4[%c0_68, %c0_69] : memref<32x32xbf16, #tpu.memory_space<vmem>>, vector<32x32xbf16>
    %cst_70 = arith.constant dense<0.000000e+00> : vector<128x32xf32>
    %228 = tpu.matmul %226, %227, %cst_70 {dimension_numbers = #tpu.dot_dimension_numbers<[1], [0], [0], [1], [0, 0, 1, 1], [], []>} : vector<128x32xbf16>, vector<32x32xbf16>, vector<128x32xf32> -> vector<128x32xf32>
    %c0_71 = arith.constant 0 : index
    %c0_72 = arith.constant 0 : index
    %229 = vector.load %arg5[%c0_71, %c0_72] : memref<1x32xf32, #tpu.memory_space<vmem>>, vector<1x32xf32>
    %230 = vector.broadcast %229 : vector<1x32xf32> to vector<128x32xf32>
    %231 = arith.addf %228, %230 : vector<128x32xf32>
    %c0_73 = arith.constant 0 : index
    %c0_74 = arith.constant 0 : index
    %232 = vector.load %arg6[%c0_73, %c0_74] : memref<128x32xf32, #tpu.memory_space<vmem>>, vector<128x32xf32>
    tpu.vector_store %arg6[%c0_73, %c0_74], %231 {strides = array<i32>} : memref<128x32xf32, #tpu.memory_space<vmem>>, vector<128x32xf32>,
    return
  }
  func.func @transform_0(%arg0: i32) -> (i32, i32) {
    %c0_i32 = arith.constant 0 : i32
    %c0_i32_0 = arith.constant 0 : i32
    %c0_i32_1 = arith.constant 0 : i32
    return %c0_i32, %c0_i32_0 : i32, i32
  }
  func.func @transform_1(%arg0: i32) -> (i32, i32) {
    %c0_i32 = arith.constant 0 : i32
    %c0_i32_0 = arith.constant 0 : i32
    %c0_i32_1 = arith.constant 0 : i32
    return %c0_i32, %c0_i32_0 : i32, i32
  }
  func.func @transform_2(%arg0: i32) -> (i32, i32) {
    %c0_i32 = arith.constant 0 : i32
    %c0_i32_0 = arith.constant 0 : i32
    %c0_i32_1 = arith.constant 0 : i32
    return %c0_i32, %c0_i32_0 : i32, i32
  }
  func.func @transform_3(%arg0: i32) -> (i32, i32) {
    %c0_i32 = arith.constant 0 : i32
    %c0_i32_0 = arith.constant 0 : i32
    %c0_i32_1 = arith.constant 0 : i32
    return %c0_i32, %c0_i32_0 : i32, i32
  }
  func.func @transform_4(%arg0: i32) -> (i32, i32) {
    %c0_i32 = arith.constant 0 : i32
    %c0_i32_0 = arith.constant 0 : i32
    %c0_i32_1 = arith.constant 0 : i32
    return %c0_i32, %c0_i32_0 : i32, i32
  }
  func.func @transform_5(%arg0: i32) -> (i32, i32) {
    %c0_i32 = arith.constant 0 : i32
    %c0_i32_0 = arith.constant 0 : i32
    %c0_i32_1 = arith.constant 0 : i32
    return %c0_i32, %c0_i32_0 : i32, i32
  }
}

</mosaic_0001>

<bundles_post_ra>
// kernel: img_feat_to_grid_forward.1
= control target key start
LH: loop header
LB: loop body
LE: loop exit
PB: predicated region body
PF: predicated region fallthrough
CT: control target
= control target key end

     0   :  { %10 = vsyncpa [#allocation3], 0  ;;  %s5133_s0 = inlined_call_operand.hbm [shape: f32[128,32], index: 0, kind: input, shape index: {}]   ;;  %s5134_s1 = inlined_call_operand.hbm [shape: f32[64,96], index: 1, kind: input, shape index: {}]   ;;  %s5135_s2 = inlined_call_operand.hbm [shape: bf16[32,96], index: 2, kind: input, shape index: {}]   ;;  %s5136_s3 = inlined_call_operand.hbm [shape: bf16[32,32], index: 3, kind: input, shape index: {}]   ;;  %s5137_s4 = inlined_call_operand.vmem [shape: f32[1,32], index: 4, kind: input, shape index: {}]   ;;  %s5138_s5 = inlined_call_operand.vmem [shape: f32[128,32], index: 5, kind: output, shape index: {}]  }
   0x1   :  { %11 = vsyncpa [#allocation5], 0 }
   0x2   :  { %12 = vsyncpa [#allocation8], 0  ;;  %s3748_s18 = smov [#allocation4]   ;;  %s3749_s20 = smov [#allocation2]  }
   0x3   :  { %s30_s19 = sshll.u32 %s3748_s18, 4  ;;  %s18_s21 = sshll.u32 %s3749_s20, 4  ;;  %s31_s19 = int_to_ptr.vmem [resolvable:$true] %s30_s19  ;;  %s3788_s21 = int_to_ptr.vmem [resolvable:$true] %s18_s21 }
   0x4   :  { %s3654_s24 = scalar_lea.hbm %s5134_s1, 1024 }
   0x5   :  { %p3655_p0 = scmp.ne.s32.totalorder %s5134_s1, %s3654_s24  ;;  %p3658_p1 = scmp.lt.u32.totalorder %s3654_s24, %s5134_s1 }
   0x7   :  { %p3660_p2 = pnand %p3658_p1, %p3655_p0 }
   0x9   :  { %3663 = shalt.err (!%p3660_p2)
}
   0xa   :  { %s3664_s29 = scalar_lea.vmem %s31_s19, 1024  ;;  %p3669_p4 = scmp.lt.s32.totalorder %s31_s19, %s31_s19 }
   0xb   :  { %p3665_p3 = scmp.ne.s32.totalorder %s31_s19, %s3664_s29  ;;  %p3670_p5 = scmp.lt.s32.totalorder %s3664_s29, %s3664_s29 }
   0xd   :  { %p3671_p6 = por %p3670_p5, %p3669_p4 }
   0xf   :  { %p3672_p7 = pnand %p3671_p6, %p3665_p3 }
  0x11   :  { %3675 = shalt.err (!%p3672_p7)
}
  0x12   :  { %s3750_s30 = smov 128   ;;  %s3751_s6 = smov 8  }
  0x13   :  { %36 = dma.hbm_to_vmem [thread:$0]  %s5134_s1, 1024, %s31_s19, [#allocation5], %s3750_s30, %s3750_s30, %s3751_s6  }
  0x14   :  { %s3676_s11 = scalar_lea.hbm %s5133_s0, 2048 }
  0x15   :  { %p3677_p8 = scmp.ne.s32.totalorder %s5133_s0, %s3676_s11  ;;  %p3680_p9 = scmp.lt.u32.totalorder %s3676_s11, %s5133_s0 }
  0x17   :  { %p3682_p10 = pnand %p3680_p9, %p3677_p8 }
  0x19   :  { %3685 = shalt.err (!%p3682_p10)
}
  0x1a   :  { %s3686_s16 = scalar_lea.vmem %s3788_s21, 2048  ;;  %p3691_p12 = scmp.lt.s32.totalorder %s3788_s21, %s3788_s21 }
  0x1b   :  { %p3687_p11 = scmp.ne.s32.totalorder %s3788_s21, %s3686_s16  ;;  %p3692_p13 = scmp.lt.s32.totalorder %s3686_s16, %s3686_s16 }
  0x1d   :  { %p3693_p0 = por %p3692_p13, %p3691_p12 }
  0x1f   :  { %p3694_p1 = pnand %p3693_p0, %p3687_p11 }
  0x21   :  { %3697 = shalt.err (!%p3694_p1)
}
  0x22   :  { %24 = dma.hbm_to_vmem [thread:$0]  %s5133_s0, 2048, %s3788_s21, [#allocation3], %s3750_s30, %s3750_s30, %s3751_s6  }
  0x23   :  { %s3752_s18 = smov [#allocation6]   ;;  %s3698_s23 = scalar_lea.hbm %s5135_s2, 256 }
  0x24   :  { %s42_s19 = sshll.u32 %s3752_s18, 4  ;;  %p3699_p2 = scmp.ne.s32.totalorder %s5135_s2, %s3698_s23  ;;  %s43_s19 = int_to_ptr.vmem [resolvable:$true] %s42_s19 }
  0x25   :  { %p3702_p3 = scmp.lt.u32.totalorder %s3698_s23, %s5135_s2 }
  0x27   :  { %p3704_p4 = pnand %p3702_p3, %p3699_p2 }
  0x29   :  { %3707 = shalt.err (!%p3704_p4)
}
  0x2a   :  { %s3708_s28 = scalar_lea.vmem %s43_s19, 256  ;;  %p3713_p6 = scmp.lt.s32.totalorder %s43_s19, %s43_s19 }
  0x2b   :  { %p3709_p5 = scmp.ne.s32.totalorder %s43_s19, %s3708_s28  ;;  %p3714_p7 = scmp.lt.s32.totalorder %s3708_s28, %s3708_s28 }
  0x2d   :  { %p3715_p8 = por %p3714_p7, %p3713_p6 }
  0x2f   :  { %p3716_p9 = pnand %p3715_p8, %p3709_p5 }
  0x31   :  { %3719 = shalt.err (!%p3716_p9)
}
  0x32   :  { %s3753_s0 = smov 64   ;;  %s3754_s21 = smov 4  }
  0x33   :  { %48 = dma.hbm_to_vmem [thread:$0]  %s5135_s2, 256, %s43_s19, [#allocation5], %s3753_s0, %s3753_s0, %s3754_s21  }
  0x34   :  { %s3755_s6 = smov [#allocation7]   ;;  %s3720_s10 = scalar_lea.hbm %s5136_s3, 256 }
  0x35   :  { %s54_s7 = sshll.u32 %s3755_s6, 4  ;;  %p3721_p10 = scmp.ne.s32.totalorder %s5136_s3, %s3720_s10  ;;  %s55_s7 = int_to_ptr.vmem [resolvable:$true] %s54_s7 }
  0x36   :  { %p3724_p11 = scmp.lt.u32.totalorder %s3720_s10, %s5136_s3 }
  0x38   :  { %p3726_p12 = pnand %p3724_p11, %p3721_p10 }
  0x3a   :  { %3729 = shalt.err (!%p3726_p12)
}
  0x3b   :  { %s3730_s15 = scalar_lea.vmem %s55_s7, 256  ;;  %p3735_p0 = scmp.lt.s32.totalorder %s55_s7, %s55_s7 }
  0x3c   :  { %p3731_p13 = scmp.ne.s32.totalorder %s55_s7, %s3730_s15  ;;  %p3736_p1 = scmp.lt.s32.totalorder %s3730_s15, %s3730_s15 }
  0x3e   :  { %p3737_p2 = por %p3736_p1, %p3735_p0 }
  0x40   :  { %p3738_p3 = pnand %p3737_p2, %p3731_p13 }
  0x42   :  { %3741 = shalt.err (!%p3738_p3)
}
  0x43   :  { %60 = dma.hbm_to_vmem [thread:$0]  %s5136_s3, 256, %s55_s7, [#allocation8], %s3753_s0, %s3753_s0, %s3754_s21  }
  0x44   :  { %3742 = dma.done.wait [#allocation3], 2048  }
  0x45   :  { %3743 = vsyncadd [#allocation3], 4294965248 }
  0x46   :  { %3744 = dma.done.wait [#allocation5], 1280  }
  0x47   :  { %3745 = vsyncadd [#allocation5], 4294966016 }
  0x48   :  { %3746 = dma.done.wait [#allocation8], 256  }
  0x49   :  { %3747 = vsyncadd [#allocation8], 4294967040  ;;  %v3384_v0 = vld [vmem:[#allocation6] sm:$0xff]   ;;  %v3385_v1 = vld [vmem:[#allocation6 + $0x8] sm:$0xff]   ;;  %vm116_vm0 = vcmask 261120   ;;  %v90_v14 = vlaneseq  ;;  %v3756_v18 = vmov 0  }
  0x4a   :  { %2994 = vmatprep.subr.bf16.mxu1 %v3384_v0  ;;  %v92_v2 = vld [vmem:[#allocation2] sm:$0xff]  ;;  %v93_v3 = vld [vmem:[#allocation2 + $0x8] sm:$0xff]  ;;  %v94_v5 = vld [vmem:[#allocation2 + $0x10] sm:$0xff]  ;;  %s3757_s3 = smov 96  }
  0x4b   :  { %2995 = vmatpush3.bf16.msra.mxu1 %v3384_v0  ;;  %v100_v4 = vpack.c.bf16 %v93_v3, %v92_v2  ;;  %v95_v6 = vld [vmem:[#allocation2 + $0x18] sm:$0xff]  ;;  %v96_v7 = vld [vmem:[#allocation2 + $0x20] sm:$0xff]  ;;  %v97_v8 = vld [vmem:[#allocation2 + $0x28] sm:$0xff]  ;;  %v91_v15 = vand.u32 127, %v90_v14  ;;  %v204_v16 = vshrl.u32 %v90_v14, 7 }
  0x4c   :  { %2996 = vmatprep.subr.bf16.mxu1 %v3385_v1  ;;  %v101_v9 = vpack.c.bf16 %v95_v6, %v94_v5  ;;  %v102_v10 = vpack.c.bf16 %v97_v8, %v96_v7  ;;  %v98_v11 = vld [vmem:[#allocation2 + $0x30] sm:$0xff]  ;;  %v99_v12 = vld [vmem:[#allocation2 + $0x38] sm:$0xff]  ;;  %v82_v25 = vld [vmem:[#allocation4] sm:$0xff] }
  0x4d   :  { %2998 = vmatprep.mubr.msk.bf16.mxu1 %vm116_vm0, %v100_v4  ;;  %v103_v13 = vpack.c.bf16 %v99_v12, %v98_v11  ;;  %vm413_vm1 = vcmp.ge.s32.totalorder %v91_v15, 8  ;;  %vm414_vm2 = vcmp.lt.s32.totalorder %v91_v15, 16  ;;  %vm199_vm3 = vcmp.lt.s32.totalorder %v91_v15, 8  ;;  %v84_v21 = vld [vmem:[#allocation4 + $0x10] sm:$0xff]  ;;  %v85_v23 = vld [vmem:[#allocation4 + $0x18] sm:$0xff]  ;;  %v83_v26 = vld [vmem:[#allocation4 + $0x8] sm:$0xff] }
  0x4e   :  { %vm415_vm4 = vmand %vm413_vm1, %vm414_vm2  ;;  %v205_v17 = vsub.s32 0, %v204_v16  ;;  %v88_v37 = vld [vmem:[#allocation4 + $0x30] sm:$0xff]  ;;  %vm789_vm9 = vcmp.ge.s32.totalorder %v91_v15, 16  ;;  %vm790_vm10 = vcmp.lt.s32.totalorder %v91_v15, 24  ;;  %v86_v38 = vld [vmem:[#allocation4 + $0x20] sm:$0xff]  ;;  %vm1080_vm13 = vcmp.ge.s32.totalorder %v91_v15, 24 }
  0x4f   :  { %2997 = vmatpush3.bf16.msra.mxu1 %v3385_v1  ;;  %vm201_vm5 = vmpackc.low %vm199_vm3, %vm199_vm3  ;;  %v89_v42 = vld [vmem:[#allocation4 + $0x38] sm:$0xff]  ;;  %v87_v45 = vld [vmem:[#allocation4 + $0x28] sm:$0xff]  ;;  %vm1081_vm14 = vcmp.lt.s32.totalorder %v91_v15, 32 }
  0x50   :  { %vm416_vm6 = vmpackc.low %vm415_vm4, %vm415_vm4  ;;  %v202_v19 = vsel %vm201_vm5, 65537, %v3756_v18 }
  0x51   :  { %v417_v20 = vsel %vm416_vm6, 65537, %v3756_v18  ;;  %v3851_v27 = vrot.slane %v202_v19, %v205_v17  ;;  %vm791_vm11 = vmand %vm789_vm9, %vm790_vm10  ;;  %vm313_vm9 = vcmask 523264  }
  0x52   :  { %2999 = vmatmul.mubr.msk.bf16.vlgmr.msra.gmra.mrb[0].mxu1 %vm116_vm0, %v101_v9  ;;  %v3853_v28 = vrot.slane %v417_v20, %v205_v17  ;;  %vm792_vm12 = vmpackc.low %vm791_vm11, %vm791_vm11 }
  0x53   :  { %3002 = vmatprep.mubr.msk.bf16.mxu1 %vm116_vm0, %v102_v10  ;;  %vm207_vm7 = vcmp.ne.s16.totalorder %v3851_v27, 0  ;;  %v793_v53 = vsel %vm792_vm12, 65537, %v3756_v18  ;;  %vm1082_vm15 = vmand %vm1080_vm13, %vm1081_vm14 }
  0x54   :  { %vm422_vm8 = vcmp.ne.s16.totalorder %v3853_v28, 0  ;;  %v3881_v54 = vrot.slane %v793_v53, %v205_v17  ;;  %vm1083_vm1 = vmpackc.low %vm1082_vm15, %vm1082_vm15 }
  0x55   :  { %v1084_v55 = vsel %vm1083_vm1, 65537, %v3756_v18 }
  0x56   :  { %5154 = vst [vmem:[#allocation12_spill] sm:$0xff] %v3881_v54  ;;  %v3889_v56 = vrot.slane %v1084_v55, %v205_v17  ;;  %vm798_vm5 = vcmp.ne.s16.totalorder %v3881_v54, 0 }
  0x58   :  { %5155 = vst [vmem:[#allocation13_spill] sm:$0xff] %v3889_v56  ;;  %vm1089_vm6 = vcmp.ne.s16.totalorder %v3889_v56, 0 }
  0x5a   :  { %3003 = vmatmul.mubr.msk.bf16.gmra.mrb[4].mxu1 %vm116_vm0, %v103_v13 }
 0x125   :  { %v3000_v22 = vpop.f32.mrb[0].mxu1 }
 0x126   :  { %v163_v24 = vpop.f32.mrb[1].mxu1  ;;  %v172_v30 = vadd.f32 %v3000_v22, %v84_v21 }
 0x127   :  { %v3001_v29 = vpop.f32.mrb[2].mxu1  ;;  %v164_v33 = vadd.f32 %v163_v24, %v82_v25 }
 0x128   :  { %v175_v31 = vadd.f32 %v3001_v29, %v85_v23  ;;  %v166_v32 = vpop.f32.mrb[3].mxu1 }
 0x129   :  { %v167_v34 = vadd.f32 %v166_v32, %v83_v26 }
 0x12a   :  { %v3855_v35 = vpack.c.bf16 %v175_v31, %v172_v30 }
 0x12b   :  { %v3859_v36 = vpack.c.bf16 %v167_v34, %v164_v33 }
 0x12c   :  { %v209_v12 = vsel %vm207_vm7, %v3855_v35, 0  ;;  %v424_v13 = vsel %vm422_vm8, %v3855_v35, 0  ;;  %v800_v21 = vsel %vm798_vm5, %v3855_v35, 0  ;;  %v1091_v25 = vsel %vm1089_vm6, %v3855_v35, 0 }
 0x12d   :  { %v3004_v39 = vpop.f32.mrb[4].mxu1  ;;  %216 = vrot.lane.b32.xlu0 %v3859_v36, %s3757_s3  ;;  %v208_v40 = vsel %vm207_vm7, %v3859_v36, 0  ;;  %v423_v41 = vsel %vm422_vm8, %v3859_v36, 0  ;;  %v799_v20 = vsel %vm798_vm5, %v3859_v36, 0  ;;  %v1090_v24 = vsel %vm1089_vm6, %v3859_v36, 0 }
 0x12e   :  { %v188_v43 = vadd.f32 %v3004_v39, %v88_v37  ;;  %v179_v44 = vpop.f32.mrb[5].mxu1  ;;  %3014 = vmatprep.mubr.msk.bf16.mxu1 %vm116_vm0, %v208_v40  ;;  %3030 = vmatprep.mubr.msk.bf16.mxu0 %vm116_vm0, %v423_v41 }
 0x12f   :  { %v180_v46 = vadd.f32 %v179_v44, %v86_v38  ;;  %v3005_v47 = vpop.f32.mrb[6].mxu1 }
 0x130   :  { %v191_v48 = vadd.f32 %v3005_v47, %v89_v42  ;;  %v182_v49 = vpop.f32.mrb[7].mxu1 }
 0x131   :  { %v183_v50 = vadd.f32 %v182_v49, %v87_v45  ;;  %218 = vrot.lane.b32.xlu0 %v3855_v35, %s3757_s3 }
 0x132   :  { %v3873_v51 = vpack.c.bf16 %v191_v48, %v188_v43 }
 0x133   :  { %v3875_v52 = vpack.c.bf16 %v183_v50, %v180_v46 }
 0x134   :  { %v211_v18 = vsel %vm207_vm7, %v3873_v51, 0  ;;  %v426_v19 = vsel %vm422_vm8, %v3873_v51, 0  ;;  %v802_v23 = vsel %vm798_vm5, %v3873_v51, 0  ;;  %v1093_v29 = vsel %vm1089_vm6, %v3873_v51, 0 }
 0x135   :  { %220 = vrot.lane.b32.xlu1 %v3875_v52, %s3757_s3  ;;  %402 = vrot.lane.b32.xlu0 %v3851_v27, %s3753_s0  ;;  %v210_v14 = vsel %vm207_vm7, %v3875_v52, 0  ;;  %v425_v15 = vsel %vm422_vm8, %v3875_v52, 0  ;;  %v801_v22 = vsel %vm798_vm5, %v3875_v52, 0  ;;  %v1092_v26 = vsel %vm1089_vm6, %v3875_v52, 0 }
 0x139   :  { %222 = vrot.lane.b32.xlu1 %v3873_v51, %s3757_s3  ;;  %968 = vrot.lane.b32.xlu0 %v3881_v54, %s3753_s0 }
 0x13d   :  { %592 = vrot.lane.b32.xlu1 %v3853_v28, %s3753_s0 }
 0x141   :  { %1259 = vrot.lane.b32.xlu1 %v3889_v56, %s3753_s0 }
 0x19f   :  { %v3893_v57 = vpop.permute.xlu0 %216 }
 0x1a0   :  { %3342 = vmatprep.subr.msk.bf16.mxu1 %vm116_vm0, %v3893_v57  ;;  %3346 = vmatprep.subr.msk.bf16.mxu0 %vm116_vm0, %v3893_v57  ;;  %v3901_v58 = vsel %vm116_vm0, %v3893_v57, 0 }
 0x1a1   :  { %3007 = vmatpush3.bf16.xpose.msra.mxu1 %v3901_v58  ;;  %3023 = vmatpush3.bf16.xpose.msra.mxu0 %v3901_v58 }
 0x1a3   :  { %v3905_v59 = vpop.permute.xlu0 %218 }
 0x1a4   :  { %3343 = vmatprep.subr.msk.bf16.mxu1 %vm116_vm0, %v3905_v59  ;;  %3347 = vmatprep.subr.msk.bf16.mxu0 %vm116_vm0, %v3905_v59  ;;  %v3915_v61 = vsel %vm116_vm0, %v3905_v59, 0 }
 0x1a7   :  { %v3911_v60 = vpop.permute.xlu1 %220  ;;  %v3925_v63 = vpop.permute.xlu0 %402 }
 0x1a8   :  { %5156 = vst [vmem:[#allocation14_spill] sm:$0xff] %v3925_v63  ;;  %v3932_v1 = vsel %vm116_vm0, %v3911_v60, 0  ;;  %vm404_vm3 = vcmp.ne.s16.totalorder %v3925_v63, 0 }
 0x1a9   :  { %3009 = vmatpush3.bf16.xpose.msra.mxu1 %v3915_v61  ;;  %3025 = vmatpush3.bf16.xpose.msra.mxu0 %v3915_v61  ;;  %v406_v5 = vsel %vm404_vm3, %v3855_v35, 0  ;;  %v405_v6 = vsel %vm404_vm3, %v3859_v36, 0  ;;  %v407_v16 = vsel %vm404_vm3, %v3875_v52, 0  ;;  %v408_v17 = vsel %vm404_vm3, %v3873_v51, 0 }
 0x1aa   :  { %3344 = vmatprep.subr.msk.bf16.mxu1 %vm116_vm0, %v3911_v60  ;;  %3348 = vmatprep.subr.msk.bf16.mxu0 %vm116_vm0, %v3911_v60 }
 0x1ab   :  { %v3923_v62 = vpop.permute.xlu1 %222  ;;  %v3946_v4 = vpop.permute.xlu0 %968 }
 0x1ac   :  { %5157 = vst [vmem:[#allocation15_spill] sm:$0xff] %v3946_v4  ;;  %vm970_vm4 = vcmp.ne.s16.totalorder %v3946_v4, 0  ;;  %v246_v7 = vsel %vm116_vm0, %v3923_v62, 0 }
 0x1ad   :  { %v972_v8 = vsel %vm970_vm4, %v3855_v35, 0  ;;  %v971_v9 = vsel %vm970_vm4, %v3859_v36, 0 }
 0x1af   :  { %v3927_v0 = vpop.permute.xlu1 %592 }
 0x1b0   :  { %vm594_vm2 = vcmp.ne.s16.totalorder %v3927_v0, 0 }
 0x1b1   :  { %3011 = vmatpush3.bf16.xpose.msra.mxu1 %v3932_v1  ;;  %3027 = vmatpush3.bf16.xpose.msra.mxu0 %v3932_v1  ;;  %v596_v2 = vsel %vm594_vm2, %v3855_v35, 0  ;;  %v595_v3 = vsel %vm594_vm2, %v3859_v36, 0  ;;  %v597_v10 = vsel %vm594_vm2, %v3875_v52, 0  ;;  %v598_v11 = vsel %vm594_vm2, %v3873_v51, 0 }
 0x1b2   :  { %609 = vrot.lane.b32.xlu1 %v596_v2, %s3753_s0  ;;  %3345 = vmatprep.subr.msk.bf16.mxu1 %vm116_vm0, %v3923_v62 }
 0x1b3   :  { %3349 = vmatprep.subr.msk.bf16.mxu0 %vm116_vm0, %v3923_v62  ;;  %607 = vrot.lane.b32.xlu0 %v595_v3, %s3753_s0  ;;  %v4066_v30 = vpop.permute.xlu1 %1259 }
 0x1b4   :  { %vm1261_vm10 = vcmp.ne.s16.totalorder %v4066_v30, 0 }
 0x1b6   :  { %702 = vrot.lane.b32.xlu1 %v406_v5, %s3753_s0 }
 0x1b7   :  { %700 = vrot.lane.b32.xlu0 %v405_v6, %s3753_s0 }
 0x1b9   :  { %3013 = vmatpush3.bf16.xpose.msra.mxu1 %v246_v7  ;;  %3029 = vmatpush3.bf16.xpose.msra.mxu0 %v246_v7 }
 0x1ba   :  { %3350 = vmatprep.subr.msk.bf16.mxu0 %vm116_vm0, %v3893_v57  ;;  %985 = vrot.lane.b32.xlu1 %v972_v8, %s3753_s0 }
 0x1bb   :  { %983 = vrot.lane.b32.xlu0 %v971_v9, %s3753_s0 }
 0x1be   :  { %611 = vrot.lane.b32.xlu1 %v597_v10, %s3753_s0 }
 0x1bf   :  { %613 = vrot.lane.b32.xlu0 %v598_v11, %s3753_s0 }
 0x1c0   :  { %3015 = vmatmul.mubr.msk.bf16.vlgmr.msra.gmra.mrb[8].mxu1 %vm116_vm0, %v209_v12  ;;  %3031 = vmatmul.mubr.msk.bf16.vlgmr.msra.gmra.mrb[0].mxu0 %vm116_vm0, %v424_v13 }
 0x1c1   :  { %3018 = vmatprep.mubr.msk.bf16.mxu1 %vm116_vm0, %v210_v14  ;;  %3034 = vmatprep.mubr.msk.bf16.mxu0 %vm116_vm0, %v425_v15 }
 0x1c2   :  { %3071 = vmatpush3.bf16.xpose.msra.mxu0 %v3901_v58  ;;  %704 = vrot.lane.b32.xlu1 %v407_v16, %s3753_s0 }
 0x1c3   :  { %706 = vrot.lane.b32.xlu0 %v408_v17, %s3753_s0  ;;  %3351 = vmatprep.subr.msk.bf16.mxu0 %vm116_vm0, %v3905_v59 }
 0x1c8   :  { %3019 = vmatmul.mubr.msk.bf16.gmra.mrb[12].mxu1 %vm116_vm0, %v211_v18  ;;  %3035 = vmatmul.mubr.msk.bf16.gmra.mrb[4].mxu0 %vm116_vm0, %v426_v19 }
 0x1c9   :  { %3078 = vmatprep.mubr.msk.bf16.mxu0 %vm116_vm0, %v799_v20 }
 0x1ca   :  { %3073 = vmatpush3.bf16.xpose.msra.mxu0 %v3915_v61 }
 0x1cb   :  { %3352 = vmatprep.subr.msk.bf16.mxu0 %vm116_vm0, %v3911_v60 }
 0x1d2   :  { %3075 = vmatpush3.bf16.xpose.msra.mxu0 %v3932_v1 }
 0x1d3   :  { %3353 = vmatprep.subr.msk.bf16.mxu0 %vm116_vm0, %v3923_v62 }
 0x1da   :  { %3077 = vmatpush3.bf16.xpose.msra.mxu0 %v246_v7 }
 0x1db   :  { %3354 = vmatprep.subr.msk.bf16.mxu0 %vm116_vm0, %v3893_v57 }
 0x1e1   :  { %3079 = vmatmul.mubr.msk.bf16.vlgmr.msra.gmra.mrb[8].mxu0 %vm116_vm0, %v800_v21 }
 0x1e2   :  { %3082 = vmatprep.mubr.msk.bf16.mxu0 %vm116_vm0, %v801_v22  ;;  %3103 = vmatpush3.bf16.xpose.msra.mxu0 %v3901_v58 }
 0x1e3   :  { %3355 = vmatprep.subr.msk.bf16.mxu0 %vm116_vm0, %v3905_v59 }
 0x1e9   :  { %3083 = vmatmul.mubr.msk.bf16.gmra.mrb[12].mxu0 %vm116_vm0, %v802_v23 }
 0x1ea   :  { %3105 = vmatpush3.bf16.xpose.msra.mxu0 %v3915_v61  ;;  %3110 = vmatprep.mubr.msk.bf16.mxu0 %vm116_vm0, %v1090_v24 }
 0x1eb   :  { %3356 = vmatprep.subr.msk.bf16.mxu0 %vm116_vm0, %v3911_v60 }
 0x1f2   :  { %3107 = vmatpush3.bf16.xpose.msra.mxu0 %v3932_v1 }
 0x1f3   :  { %3357 = vmatprep.subr.msk.bf16.mxu0 %vm116_vm0, %v3923_v62 }
 0x1fa   :  { %3109 = vmatpush3.bf16.xpose.msra.mxu0 %v246_v7 }
 0x201   :  { %3111 = vmatmul.mubr.msk.bf16.vlgmr.msra.gmra.mrb[16].mxu0 %vm116_vm0, %v1091_v25 }
 0x202   :  { %3114 = vmatprep.mubr.msk.bf16.mxu0 %vm116_vm0, %v1092_v26 }
 0x209   :  { %3115 = vmatmul.mubr.msk.bf16.gmra.mrb[20].mxu0 %vm116_vm0, %v1093_v29 }
 0x224   :  { %v610_v31 = vpop.permute.xlu1 %609 }
 0x225   :  { %v608_v32 = vpop.permute.xlu0 %607 }
 0x226   :  { %3038 = vmatprep.subr.bf16.mxu1 %v608_v32 }
 0x227   :  { %3039 = vmatpush3.bf16.msra.mxu1 %v608_v32 }
 0x228   :  { %3040 = vmatprep.subr.bf16.mxu1 %v610_v31  ;;  %v4068_v33 = vpop.permute.xlu1 %702 }
 0x229   :  { %v4070_v34 = vpop.permute.xlu0 %700 }
 0x22b   :  { %3041 = vmatpush3.bf16.msra.mxu1 %v610_v31 }
 0x22c   :  { %v4072_v37 = vpop.permute.xlu1 %985 }
 0x22d   :  { %v4074_v38 = vpop.permute.xlu0 %983 }
 0x230   :  { %v612_v39 = vpop.permute.xlu1 %611 }
 0x231   :  { %3042 = vmatprep.subr.bf16.mxu1 %v612_v39  ;;  %v614_v40 = vpop.permute.xlu0 %613 }
 0x232   :  { %3043 = vmatpush3.bf16.msra.mxu1 %v612_v39  ;;  %v973_v39 = vsel %vm970_vm4, %v3875_v52, 0 }
 0x233   :  { %3044 = vmatprep.subr.bf16.mxu1 %v614_v40 }
 0x236   :  { %3045 = vmatpush3.bf16.msra.mxu1 %v614_v40  ;;  %v974_v40 = vsel %vm970_vm4, %v3873_v51, 0 }
 0x237   :  { %3054 = vmatprep.subr.bf16.mxu1 %v4070_v34 }
 0x293   :  { %v4077_v41 = vpop.f32.mrb[8].mxu1  ;;  %v4079_v42 = vpop.f32.mrb[0].mxu0 }
 0x294   :  { %v4081_v43 = vpop.f32.mrb[9].mxu1  ;;  %v4083_v44 = vpop.f32.mrb[1].mxu0  ;;  %v510_v45 = vsel %vm313_vm9, %v4079_v42, -inf  ;;  %v320_v46 = vsel %vm313_vm9, %v4077_v41, -inf }
 0x295   :  { %511 = vmax.xlane.f32.xlu0 %v510_v45  ;;  %v4089_v47 = vpop.f32.mrb[2].mxu0  ;;  %321 = vmax.xlane.f32.xlu1 %v320_v46  ;;  %v4091_v48 = vpop.f32.mrb[10].mxu1  ;;  %v504_v53 = vsel %vm313_vm9, %v4083_v44, -inf  ;;  %v314_v55 = vsel %vm313_vm9, %v4081_v43, -inf }
 0x296   :  { %v4093_v49 = vpop.f32.mrb[11].mxu1  ;;  %v4095_v50 = vpop.f32.mrb[3].mxu0  ;;  %v513_v61 = vsel %vm313_vm9, %v4089_v47, -inf  ;;  %v323_v7 = vsel %vm313_vm9, %v4091_v48, -inf }
 0x297   :  { %v507_v62 = vsel %vm313_vm9, %v4095_v50, -inf  ;;  %v317_v8 = vsel %vm313_vm9, %v4093_v49, -inf }
 0x299   :  { %505 = vmax.xlane.f32.xlu0 %v504_v53  ;;  %315 = vmax.xlane.f32.xlu1 %v314_v55  ;;  %v1262_v55 = vsel %vm1261_vm10, %v3859_v36, 0 }
 0x29b   :  { %v4101_v57 = vpop.f32.mrb[12].mxu1  ;;  %v4103_v58 = vpop.f32.mrb[4].mxu0 }
 0x29c   :  { %v4105_v59 = vpop.f32.mrb[13].mxu1  ;;  %v4107_v60 = vpop.f32.mrb[5].mxu0  ;;  %v522_v6 = vsel %vm313_vm9, %v4103_v58, -inf  ;;  %v332_v9 = vsel %vm313_vm9, %v4101_v57, -inf }
 0x29d   :  { %514 = vmax.xlane.f32.xlu0 %v513_v61  ;;  %v4113_v1 = vpop.f32.mrb[6].mxu0  ;;  %508 = vmax.xlane.f32.xlu1 %v507_v62  ;;  %v4115_v2 = vpop.f32.mrb[14].mxu1  ;;  %v516_v11 = vsel %vm313_vm9, %v4107_v60, -inf  ;;  %v326_v12 = vsel %vm313_vm9, %v4105_v59, -inf }
 0x29e   :  { %v4117_v3 = vpop.f32.mrb[15].mxu1  ;;  %v4119_v5 = vpop.f32.mrb[7].mxu0  ;;  %v525_v10 = vsel %vm313_vm9, %v4113_v1, -inf  ;;  %v335_v13 = vsel %vm313_vm9, %v4115_v2, -inf }
 0x29f   :  { %v519_v14 = vsel %vm313_vm9, %v4119_v5, -inf  ;;  %v329_v16 = vsel %vm313_vm9, %v4117_v3, -inf }
 0x2a1   :  { %523 = vmax.xlane.f32.xlu1 %v522_v6  ;;  %324 = vmax.xlane.f32.xlu0 %v323_v7 }
 0x2a5   :  { %318 = vmax.xlane.f32.xlu0 %v317_v8  ;;  %333 = vmax.xlane.f32.xlu1 %v332_v9 }
 0x2a9   :  { %526 = vmax.xlane.f32.xlu0 %v525_v10  ;;  %517 = vmax.xlane.f32.xlu1 %v516_v11 }
 0x2ad   :  { %327 = vmax.xlane.f32.xlu1 %v326_v12  ;;  %336 = vmax.xlane.f32.xlu0 %v335_v13 }
 0x2b1   :  { %520 = vmax.xlane.f32.xlu0 %v519_v14 }
 0x2b4   :  { %v4139_v15 = vpop.f32.mrb[8].mxu0 }
 0x2b5   :  { %v4143_v17 = vpop.f32.mrb[9].mxu0  ;;  %v886_v18 = vsel %vm313_vm9, %v4139_v15, -inf  ;;  %330 = vmax.xlane.f32.xlu0 %v329_v16 }
 0x2b6   :  { %v4147_v19 = vpop.f32.mrb[10].mxu0  ;;  %887 = vmax.xlane.f32.xlu1 %v886_v18  ;;  %v880_v22 = vsel %vm313_vm9, %v4143_v17, -inf }
 0x2b7   :  { %v4149_v20 = vpop.f32.mrb[11].mxu0  ;;  %v889_v21 = vsel %vm313_vm9, %v4147_v19, -inf }
 0x2b8   :  { %v883_v24 = vsel %vm313_vm9, %v4149_v20, -inf }
 0x2b9   :  { %890 = vmax.xlane.f32.xlu0 %v889_v21 }
 0x2ba   :  { %881 = vmax.xlane.f32.xlu1 %v880_v22  ;;  %v4218_v22 = vpop.permute.xlu1 %704 }
 0x2bc   :  { %v4155_v23 = vpop.f32.mrb[12].mxu0 }
 0x2bd   :  { %v4159_v25 = vpop.f32.mrb[13].mxu0  ;;  %v898_v26 = vsel %vm313_vm9, %v4155_v23, -inf  ;;  %884 = vmax.xlane.f32.xlu0 %v883_v24  ;;  %v4220_v24 = vpop.permute.xlu0 %706 }
 0x2be   :  { %v4163_v29 = vpop.f32.mrb[14].mxu0  ;;  %899 = vmax.xlane.f32.xlu1 %v898_v26  ;;  %v892_v32 = vsel %vm313_vm9, %v4159_v25, -inf }
 0x2bf   :  { %v4165_v31 = vpop.f32.mrb[15].mxu0  ;;  %v901_v9 = vsel %vm313_vm9, %v4163_v29, -inf }
 0x2c0   :  { %v895_v36 = vsel %vm313_vm9, %v4165_v31, -inf }
 0x2c2   :  { %893 = vmax.xlane.f32.xlu1 %v892_v32 }
 0x2d3   :  { %987 = vrot.lane.b32.xlu1 %v973_v39, %s3753_s0  ;;  %989 = vrot.lane.b32.xlu0 %v974_v40, %s3753_s0 }
 0x2d4   :  { %v4178_v45 = vpop.f32.mrb[16].mxu0 }
 0x2d5   :  { %v4180_v46 = vpop.f32.mrb[17].mxu0  ;;  %v1177_v11 = vsel %vm313_vm9, %v4178_v45, -inf }
 0x2d6   :  { %v4182_v53 = vpop.f32.mrb[18].mxu0  ;;  %v1171_v12 = vsel %vm313_vm9, %v4180_v46, -inf }
 0x2d7   :  { %v4187_v61 = vpop.f32.mrb[19].mxu0  ;;  %1274 = vrot.lane.b32.xlu0 %v1262_v55, %s3753_s0  ;;  %v1180_v13 = vsel %vm313_vm9, %v4182_v53, -inf }
 0x2d8   :  { %v1174_v14 = vsel %vm313_vm9, %v4187_v61, -inf }
 0x2dc   :  { %v4190_v62 = vpop.f32.mrb[20].mxu0 }
 0x2dd   :  { %v4192_v6 = vpop.f32.mrb[21].mxu0  ;;  %v1189_v16 = vsel %vm313_vm9, %v4190_v62, -inf }
 0x2de   :  { %v4194_v7 = vpop.f32.mrb[22].mxu0  ;;  %v1183_v10 = vsel %vm313_vm9, %v4192_v6, -inf }
 0x2df   :  { %v4196_v8 = vpop.f32.mrb[23].mxu0  ;;  %v1192_v18 = vsel %vm313_vm9, %v4194_v7, -inf }
 0x2e0   :  { %v1186_v21 = vsel %vm313_vm9, %v4196_v8, -inf }
 0x2f6   :  { %902 = vmax.xlane.f32.xlu0 %v901_v9 }
 0x2f7   :  { %1184 = vmax.xlane.f32.xlu1 %v1183_v10 }
 0x2fa   :  { %896 = vmax.xlane.f32.xlu0 %v895_v36 }
 0x2fe   :  { %1178 = vmax.xlane.f32.xlu0 %v1177_v11 }
 0x302   :  { %1172 = vmax.xlane.f32.xlu0 %v1171_v12 }
 0x306   :  { %1181 = vmax.xlane.f32.xlu0 %v1180_v13 }
 0x30a   :  { %1175 = vmax.xlane.f32.xlu0 %v1174_v14 }
 0x30e   :  { %1190 = vmax.xlane.f32.xlu0 %v1189_v16 }
 0x312   :  { %1193 = vmax.xlane.f32.xlu0 %v1192_v18 }
 0x316   :  { %1187 = vmax.xlane.f32.xlu0 %v1186_v21 }
 0x322   :  { %v512_v26 = vpop.xlane.xlu0 %511  ;;  %v322_v32 = vpop.xlane.xlu1 %321 }
 0x323   :  { %v530_v39 = vsub.f32 %v4079_v42, %v512_v26  ;;  %v340_v40 = vsub.f32 %v4077_v41, %v322_v32 }
 0x325   :  { %v540_v55 = vmul.f32 1.442695, %v530_v39  ;;  %v350_v9 = vmul.f32 1.442695, %v340_v40 }
 0x326   :  { %v506_v10 = vpop.xlane.xlu0 %505  ;;  %v316_v36 = vpop.xlane.xlu1 %315 }
 0x327   :  { %3388 = vpow2.f32 %v540_v55  ;;  %v528_v11 = vsub.f32 %v4083_v44, %v506_v10  ;;  %v338_v13 = vsub.f32 %v4081_v43, %v316_v36 }
 0x328   :  { %3390 = vpow2.f32 %v350_v9 }
 0x329   :  { %v536_v12 = vmul.f32 1.442695, %v528_v11  ;;  %v346_v21 = vmul.f32 1.442695, %v338_v13 }
 0x32a   :  { %v515_v14 = vpop.xlane.xlu0 %514  ;;  %v509_v16 = vpop.xlane.xlu1 %508 }
 0x32b   :  { %v529_v18 = vsub.f32 %v4095_v50, %v509_v16  ;;  %3392 = vpow2.f32 %v536_v12  ;;  %v531_v42 = vsub.f32 %v4089_v47, %v515_v14 }
 0x32d   :  { %v538_v41 = vmul.f32 1.442695, %v529_v18  ;;  %v542_v44 = vmul.f32 1.442695, %v531_v42 }
 0x32e   :  { %v524_v26 = vpop.xlane.xlu1 %523  ;;  %v325_v32 = vpop.xlane.xlu0 %324 }
 0x32f   :  { %3394 = vpow2.f32 %v538_v41  ;;  %v534_v39 = vsub.f32 %v4103_v58, %v524_v26  ;;  %v341_v43 = vsub.f32 %v4091_v48, %v325_v32 }
 0x330   :  { %3396 = vpow2.f32 %v346_v21 }
 0x331   :  { %v4229_v40 = vpop.eup %3388  ;;  %v548_v36 = vmul.f32 1.442695, %v534_v39  ;;  %3398 = vpow2.f32 %v542_v44  ;;  %v352_v58 = vmul.f32 1.442695, %v341_v43 }
 0x332   :  { %v319_v55 = vpop.xlane.xlu0 %318  ;;  %v334_v9 = vpop.xlane.xlu1 %333  ;;  %v558_v50 = vsel %vm313_vm9, %v4229_v40, 0.0 }
 0x333   :  { %v4234_v10 = vpop.eup %3390  ;;  %v339_v47 = vsub.f32 %v4093_v49, %v319_v55  ;;  %559 = vadd.xlane.f32.xlu1 %v558_v50  ;;  %v344_v11 = vsub.f32 %v4101_v57, %v334_v9 }
 0x334   :  { %v368_v48 = vsel %vm313_vm9, %v4234_v10, 0.0 }
 0x335   :  { %v348_v12 = vmul.f32 1.442695, %v339_v47  ;;  %v4240_v16 = vpop.eup %3392  ;;  %v358_v49 = vmul.f32 1.442695, %v344_v11 }
 0x336   :  { %v527_v13 = vpop.xlane.xlu0 %526  ;;  %v518_v14 = vpop.xlane.xlu1 %517  ;;  %v552_v32 = vsel %vm313_vm9, %v4240_v16, 0.0 }
 0x337   :  { %3400 = vpow2.f32 %v348_v12  ;;  %v532_v18 = vsub.f32 %v4107_v60, %v518_v14  ;;  %369 = vadd.xlane.f32.xlu1 %v368_v48  ;;  %v535_v21 = vsub.f32 %v4113_v1, %v527_v13 }
 0x338   :  { %3402 = vpow2.f32 %v548_v36 }
 0x339   :  { %3404 = vpow2.f32 %v352_v58  ;;  %v544_v57 = vmul.f32 1.442695, %v532_v18  ;;  %v4244_v42 = vpop.eup %3394  ;;  %v550_v43 = vmul.f32 1.442695, %v535_v21 }
 0x33a   :  { %v328_v41 = vpop.xlane.xlu1 %327  ;;  %v337_v26 = vpop.xlane.xlu0 %336  ;;  %v555_v60 = vsel %vm313_vm9, %v4244_v42, 0.0  ;;  %3406 = vpow2.f32 %v358_v49 }
 0x33b   :  { %v4248_v39 = vpop.eup %3396  ;;  %v342_v44 = vsub.f32 %v4105_v59, %v328_v41  ;;  %553 = vadd.xlane.f32.xlu1 %v552_v32  ;;  %556 = vadd.xlane.f32.xlu0 %v555_v60  ;;  %3408 = vpow2.f32 %v544_v57  ;;  %v345_v55 = vsub.f32 %v4115_v2, %v337_v26 }
 0x33c   :  { %v362_v50 = vsel %vm313_vm9, %v4248_v39, 0.0  ;;  %v4256_v47 = vpop.eup %3398  ;;  %3410 = vpow2.f32 %v550_v43 }
 0x33d   :  { %v354_v1 = vmul.f32 1.442695, %v342_v44  ;;  %v360_v36 = vmul.f32 1.442695, %v345_v55  ;;  %v561_v2 = vsel %vm313_vm9, %v4256_v47, 0.0 }
 0x33e   :  { %v521_v9 = vpop.xlane.xlu0 %520 }
 0x33f   :  { %363 = vadd.xlane.f32.xlu1 %v362_v50  ;;  %3412 = vpow2.f32 %v354_v1  ;;  %v533_v11 = vsub.f32 %v4119_v5, %v521_v9 }
 0x340   :  { %3414 = vpow2.f32 %v360_v36 }
 0x341   :  { %v4258_v59 = vpop.eup %3400  ;;  %v546_v49 = vmul.f32 1.442695, %v533_v11 }
 0x342   :  { %v4261_v58 = vpop.eup %3402  ;;  %v331_v12 = vpop.xlane.xlu0 %330  ;;  %v365_v13 = vsel %vm313_vm9, %v4258_v59, 0.0 }
 0x343   :  { %v4267_v14 = vpop.eup %3404  ;;  %v888_v48 = vpop.xlane.xlu1 %887  ;;  %562 = vadd.xlane.f32.xlu1 %v561_v2  ;;  %366 = vadd.xlane.f32.xlu0 %v365_v13  ;;  %v343_v5 = vsub.f32 %v4117_v3, %v331_v12  ;;  %v570_v32 = vsel %vm313_vm9, %v4261_v58, 0.0 }
 0x344   :  { %v906_v18 = vsub.f32 %v4139_v15, %v888_v48  ;;  %v4271_v21 = vpop.eup %3406  ;;  %v371_v26 = vsel %vm313_vm9, %v4267_v14, 0.0 }
 0x345   :  { %v4277_v44 = vpop.eup %3408  ;;  %v356_v15 = vmul.f32 1.442695, %v343_v5  ;;  %v380_v11 = vsel %vm313_vm9, %v4271_v21, 0.0 }
 0x346   :  { %v916_v57 = vmul.f32 1.442695, %v906_v18  ;;  %v891_v41 = vpop.xlane.xlu0 %890  ;;  %v4281_v1 = vpop.eup %3410  ;;  %v564_v36 = vsel %vm313_vm9, %v4277_v44, 0.0 }
 0x347   :  { %v882_v60 = vpop.xlane.xlu1 %881  ;;  %v907_v43 = vsub.f32 %v4147_v19, %v891_v41  ;;  %372 = vadd.xlane.f32.xlu1 %v371_v26  ;;  %571 = vadd.xlane.f32.xlu0 %v570_v32  ;;  %v573_v18 = vsel %vm313_vm9, %v4281_v1, 0.0 }
 0x348   :  { %3416 = vpow2.f32 %v916_v57  ;;  %v904_v3 = vsub.f32 %v4143_v17, %v882_v60 }
 0x349   :  { %3418 = vpow2.f32 %v546_v49  ;;  %v918_v9 = vmul.f32 1.442695, %v907_v43  ;;  %v4287_v12 = vpop.eup %3412 }
 0x34a   :  { %v912_v55 = vmul.f32 1.442695, %v904_v3  ;;  %v885_v50 = vpop.xlane.xlu0 %884  ;;  %v374_v48 = vsel %vm313_vm9, %v4287_v12, 0.0  ;;  %v4295_v49 = vpop.eup %3414 }
 0x34b   :  { %v900_v19 = vpop.xlane.xlu1 %899  ;;  %v905_v2 = vsub.f32 %v4149_v20, %v885_v50  ;;  %565 = vadd.xlane.f32.xlu1 %v564_v36  ;;  %381 = vadd.xlane.f32.xlu0 %v380_v11  ;;  %v383_v26 = vsel %vm313_vm9, %v4295_v49, 0.0 }
 0x34c   :  { %3420 = vpow2.f32 %v912_v55  ;;  %v910_v17 = vsub.f32 %v4155_v23, %v900_v19 }
 0x34d   :  { %3422 = vpow2.f32 %v356_v15  ;;  %v914_v13 = vmul.f32 1.442695, %v905_v2 }
 0x34e   :  { %3424 = vpow2.f32 %v918_v9  ;;  %v924_v57 = vmul.f32 1.442695, %v910_v17 }
 0x34f   :  { %v894_v5 = vpop.xlane.xlu1 %893  ;;  %375 = vadd.xlane.f32.xlu1 %v374_v48  ;;  %574 = vadd.xlane.f32.xlu0 %v573_v18  ;;  %3426 = vpow2.f32 %v914_v13  ;;  %v4332_v48 = vpop.permute.xlu0 %989 }
 0x350   :  { %v908_v20 = vsub.f32 %v4159_v25, %v894_v5 }
 0x352   :  { %v4298_v41 = vpop.eup %3416  ;;  %v920_v23 = vmul.f32 1.442695, %v908_v20 }
 0x353   :  { %v4302_v32 = vpop.eup %3418  ;;  %v934_v60 = vsel %vm313_vm9, %v4298_v41, 0.0  ;;  %384 = vadd.xlane.f32.xlu0 %v383_v26  ;;  %v4334_v18 = vpop.permute.xlu0 %1274 }
 0x354   :  { %3428 = vpow2.f32 %v920_v23  ;;  %935 = vadd.xlane.f32.xlu1 %v934_v60  ;;  %v567_v25 = vsel %vm313_vm9, %v4302_v32, 0.0 }
 0x355   :  { %3430 = vpow2.f32 %v924_v57 }
 0x356   :  { %v4306_v43 = vpop.eup %3420 }
 0x357   :  { %v4310_v3 = vpop.eup %3422  ;;  %v928_v15 = vsel %vm313_vm9, %v4306_v43, 0.0  ;;  %568 = vadd.xlane.f32.xlu0 %v567_v25  ;;  %v4338_v25 = vpop.permute.xlu1 %987 }
 0x358   :  { %v4314_v55 = vpop.eup %3424  ;;  %929 = vadd.xlane.f32.xlu1 %v928_v15  ;;  %v377_v9 = vsel %vm313_vm9, %v4310_v3, 0.0 }
 0x359   :  { %v4318_v50 = vpop.eup %3426  ;;  %v937_v36 = vsel %vm313_vm9, %v4314_v55, 0.0 }
 0x35a   :  { %v931_v19 = vsel %vm313_vm9, %v4318_v50, 0.0 }
 0x35b   :  { %378 = vadd.xlane.f32.xlu0 %v377_v9 }
 0x35c   :  { %938 = vadd.xlane.f32.xlu1 %v937_v36 }
 0x35e   :  { %v4322_v11 = vpop.eup %3428 }
 0x35f   :  { %v4326_v2 = vpop.eup %3430  ;;  %v940_v17 = vsel %vm313_vm9, %v4322_v11, 0.0  ;;  %932 = vadd.xlane.f32.xlu0 %v931_v19 }
 0x360   :  { %941 = vadd.xlane.f32.xlu1 %v940_v17  ;;  %v946_v13 = vsel %vm313_vm9, %v4326_v2, 0.0 }
 0x363   :  { %947 = vadd.xlane.f32.xlu0 %v946_v13 }
 0x383   :  { %v903_v5 = vpop.xlane.xlu0 %902 }
 0x384   :  { %v911_v20 = vsub.f32 %v4163_v29, %v903_v5  ;;  %v1185_v19 = vpop.xlane.xlu1 %1184 }
 0x385   :  { %v1199_v29 = vsub.f32 %v4192_v6, %v1185_v19 }
 0x386   :  { %v926_v57 = vmul.f32 1.442695, %v911_v20 }
 0x387   :  { %v897_v23 = vpop.xlane.xlu0 %896 }
 0x388   :  { %3432 = vpow2.f32 %v926_v57  ;;  %v909_v26 = vsub.f32 %v4165_v31, %v897_v23  ;;  %v1211_v23 = vmul.f32 1.442695, %v1199_v29 }
 0x38a   :  { %v922_v60 = vmul.f32 1.442695, %v909_v26 }
 0x38b   :  { %v1179_v15 = vpop.xlane.xlu0 %1178 }
 0x38c   :  { %3434 = vpow2.f32 %v922_v60  ;;  %v1197_v9 = vsub.f32 %v4178_v45, %v1179_v15 }
 0x38e   :  { %v1207_v36 = vmul.f32 1.442695, %v1197_v9 }
 0x38f   :  { %v1173_v17 = vpop.xlane.xlu0 %1172 }
 0x390   :  { %3436 = vpow2.f32 %v1207_v36  ;;  %v1195_v13 = vsub.f32 %v4180_v46, %v1173_v17 }
 0x392   :  { %v4342_v56 = vpop.eup %3432  ;;  %v1203_v5 = vmul.f32 1.442695, %v1195_v13 }
 0x393   :  { %v1182_v20 = vpop.xlane.xlu0 %1181  ;;  %v949_v31 = vsel %vm313_vm9, %v4342_v56, 0.0 }
 0x394   :  { %3438 = vpow2.f32 %v1203_v5  ;;  %v1198_v57 = vsub.f32 %v4182_v53, %v1182_v20  ;;  %950 = vadd.xlane.f32.xlu0 %v949_v31 }
 0x396   :  { %v4348_v45 = vpop.eup %3434  ;;  %v1209_v26 = vmul.f32 1.442695, %v1198_v57 }
 0x397   :  { %v1176_v60 = vpop.xlane.xlu0 %1175  ;;  %v943_v46 = vsel %vm313_vm9, %v4348_v45, 0.0 }
 0x398   :  { %3440 = vpow2.f32 %v1209_v26  ;;  %v1196_v6 = vsub.f32 %v4187_v61, %v1176_v60  ;;  %944 = vadd.xlane.f32.xlu0 %v943_v46  ;;  %v1263_v60 = vsel %vm1261_vm10, %v3855_v35, 0 }
 0x399   :  { %3442 = vpow2.f32 %v1211_v23 }
 0x39a   :  { %v4353_v15 = vpop.eup %3436  ;;  %v1205_v9 = vmul.f32 1.442695, %v1196_v6 }
 0x39b   :  { %v1191_v36 = vpop.xlane.xlu0 %1190  ;;  %v1225_v53 = vsel %vm313_vm9, %v4353_v15, 0.0 }
 0x39c   :  { %3444 = vpow2.f32 %v1205_v9  ;;  %v1201_v19 = vsub.f32 %v4190_v62, %v1191_v36  ;;  %1226 = vadd.xlane.f32.xlu1 %v1225_v53  ;;  %v1264_v9 = vsel %vm1261_vm10, %v3875_v52, 0 }
 0x39e   :  { %v4358_v17 = vpop.eup %3438  ;;  %v1215_v13 = vmul.f32 1.442695, %v1201_v19 }
 0x39f   :  { %v1219_v29 = vsel %vm313_vm9, %v4358_v17, 0.0  ;;  %v1194_v46 = vpop.xlane.xlu0 %1193 }
 0x3a0   :  { %3446 = vpow2.f32 %v1215_v13  ;;  %1220 = vadd.xlane.f32.xlu1 %v1219_v29  ;;  %v1202_v29 = vsub.f32 %v4194_v7, %v1194_v46 }
 0x3a2   :  { %v4362_v61 = vpop.eup %3440  ;;  %v1217_v35 = vmul.f32 1.442695, %v1202_v29 }
 0x3a3   :  { %v1228_v5 = vsel %vm313_vm9, %v4362_v61, 0.0  ;;  %v4366_v20 = vpop.eup %3442  ;;  %v1188_v53 = vpop.xlane.xlu0 %1187 }
 0x3a4   :  { %1229 = vadd.xlane.f32.xlu1 %v1228_v5  ;;  %v1231_v62 = vsel %vm313_vm9, %v4366_v20, 0.0 }
 0x3a6   :  { %v4368_v31 = vpop.eup %3444 }
 0x3a7   :  { %v1222_v57 = vsel %vm313_vm9, %v4368_v31, 0.0 }
 0x3a8   :  { %1232 = vadd.xlane.f32.xlu1 %v1231_v62  ;;  %1223 = vadd.xlane.f32.xlu0 %v1222_v57  ;;  %v1200_v62 = vsub.f32 %v4196_v8, %v1188_v53 }
 0x3aa   :  { %v4374_v23 = vpop.eup %3446  ;;  %v1213_v52 = vmul.f32 1.442695, %v1200_v62 }
 0x3ab   :  { %v1237_v26 = vsel %vm313_vm9, %v4374_v23, 0.0 }
 0x3ac   :  { %1238 = vadd.xlane.f32.xlu0 %v1237_v26 }
 0x3b9   :  { %1276 = vrot.lane.b32.xlu1 %v1263_v60, %s3753_s0 }
 0x3c0   :  { %v560_v6 = vpop.xlane.xlu1 %559 }
 0x3c2   :  { %1278 = vrot.lane.b32.xlu0 %v1264_v9, %s3753_s0 }
 0x3c4   :  { %v370_v36 = vpop.xlane.xlu1 %369 }
 0x3c8   :  { %v554_v19 = vpop.xlane.xlu1 %553  ;;  %v557_v13 = vpop.xlane.xlu0 %556 }
 0x3c9   :  { %3448 = vrcp.f32 %v554_v19 }
 0x3ca   :  { %3450 = vrcp.f32 %v557_v13 }
 0x3cb   :  { %3452 = vrcp.f32 %v560_v6 }
 0x3cc   :  { %v364_v5 = vpop.xlane.xlu1 %363 }
 0x3d0   :  { %v563_v57 = vpop.xlane.xlu1 %562  ;;  %v367_v26 = vpop.xlane.xlu0 %366 }
 0x3d1   :  { %3454 = vrcp.f32 %v563_v57 }
 0x3d2   :  { %3456 = vpow2.f32 %v1217_v35 }
 0x3d3   :  { %v3449_v60 = vpop.eup %3448  ;;  %3458 = vpow2.f32 %v1213_v52 }
 0x3d4   :  { %v3451_v9 = vpop.eup %3450  ;;  %v572_v54 = vpop.xlane.xlu0 %571  ;;  %v584_v63 = vmul.f32 %v3449_v60, %v4240_v16  ;;  %3460 = vrcp.f32 %v364_v5 }
 0x3d5   :  { %v585_v19 = vmul.f32 %v3451_v9, %v4244_v42  ;;  %v3453_v46 = vpop.eup %3452  ;;  %v373_v29 = vpop.xlane.xlu1 %372  ;;  %3462 = vrcp.f32 %v367_v26 }
 0x3d6   :  { %v586_v6 = vmul.f32 %v3453_v46, %v4229_v40 }
 0x3d7   :  { %v599_v13 = vpack.c.bf16 %v585_v19, %v584_v63 }
 0x3d8   :  { %v382_v7 = vpop.xlane.xlu0 %381 }
 0x3d9   :  { %3046 = vmatprep.mubr.msk.bf16.mxu1 %vm313_vm9, %v599_v13  ;;  %v566_v4 = vpop.xlane.xlu1 %565 }
 0x3db   :  { %v3455_v8 = vpop.eup %3454 }
 0x3dc   :  { %v587_v53 = vmul.f32 %v3455_v8, %v4256_v47  ;;  %v575_v35 = vpop.xlane.xlu0 %574  ;;  %v4393_v62 = vpop.eup %3456 }
 0x3dd   :  { %v1240_v63 = vsel %vm313_vm9, %v4393_v62, 0.0  ;;  %v4398_v42 = vpop.eup %3458  ;;  %3464 = vrcp.f32 %v575_v35  ;;  %v376_v5 = vpop.xlane.xlu1 %375 }
 0x3de   :  { %v600_v57 = vpack.c.bf16 %v587_v53, %v586_v6  ;;  %3466 = vrcp.f32 %v566_v4  ;;  %v1234_v47 = vsel %vm313_vm9, %v4398_v42, 0.0 }
 0x3df   :  { %3468 = vrcp.f32 %v572_v54 }
 0x3e0   :  { %3047 = vmatmul.mubr.msk.bf16.vlgmr.msra.gmra.mrb[16].mxu1 %vm313_vm9, %v600_v57  ;;  %v385_v16 = vpop.xlane.xlu0 %384 }
 0x3e1   :  { %3055 = vmatpush3.bf16.msra.mxu1 %v4070_v34  ;;  %1241 = vadd.xlane.f32.xlu0 %v1240_v63  ;;  %v3461_v34 = vpop.eup %3460  ;;  %v936_v54 = vpop.xlane.xlu1 %935 }
 0x3e2   :  { %3056 = vmatprep.subr.bf16.mxu1 %v4068_v33  ;;  %v3463_v4 = vpop.eup %3462 }
 0x3e4   :  { %v569_v40 = vpop.xlane.xlu0 %568 }
 0x3e5   :  { %3057 = vmatpush3.bf16.msra.mxu1 %v4068_v33  ;;  %3470 = vrcp.f32 %v569_v40  ;;  %1235 = vadd.xlane.f32.xlu0 %v1234_v47  ;;  %v930_v8 = vpop.xlane.xlu1 %929 }
 0x3e6   :  { %3058 = vmatprep.subr.bf16.mxu1 %v4218_v22  ;;  %3472 = vrcp.f32 %v373_v29  ;;  %v395_v29 = vmul.f32 %v3463_v4, %v4258_v59 }
 0x3e7   :  { %v3465_v60 = vpop.eup %3464 }
 0x3e8   :  { %v379_v26 = vpop.xlane.xlu0 %378  ;;  %v3467_v52 = vpop.eup %3466  ;;  %v591_v19 = vmul.f32 %v3465_v60, %v4281_v1 }
 0x3e9   :  { %3059 = vmatpush3.bf16.msra.mxu1 %v4218_v22  ;;  %3474 = vrcp.f32 %v379_v26  ;;  %v3469_v33 = vpop.eup %3468  ;;  %v588_v13 = vmul.f32 %v3467_v52, %v4277_v44 }
 0x3ea   :  { %3060 = vmatprep.subr.bf16.mxu1 %v4220_v24  ;;  %3476 = vrcp.f32 %v370_v36  ;;  %v590_v36 = vmul.f32 %v3469_v33, %v4261_v58 }
 0x3eb   :  { %3478 = vrcp.f32 %v376_v5 }
 0x3ec   :  { %v933_v22 = vpop.xlane.xlu0 %932  ;;  %3480 = vrcp.f32 %v385_v16  ;;  %v602_v53 = vpack.c.bf16 %v591_v19, %v590_v36 }
 0x3ed   :  { %3061 = vmatpush3.bf16.msra.mxu1 %v4220_v24  ;;  %v394_v24 = vmul.f32 %v3461_v34, %v4248_v39  ;;  %3482 = vrcp.f32 %v933_v22 }
 0x3ee   :  { %3086 = vmatprep.subr.bf16.mxu1 %v4074_v38  ;;  %3484 = vrcp.f32 %v382_v7  ;;  %v1265_v7 = vsel %vm1261_vm10, %v3873_v51, 0 }
 0x3ef   :  { %v3471_v9 = vpop.eup %3470  ;;  %v409_v1 = vpack.c.bf16 %v395_v29, %v394_v24  ;;  %3486 = vrcp.f32 %v930_v8 }
 0x3f0   :  { %v589_v46 = vmul.f32 %v3471_v9, %v4302_v32  ;;  %v3473_v35 = vpop.eup %3472  ;;  %v939_v32 = vpop.xlane.xlu1 %938 }
 0x3f1   :  { %v397_v58 = vmul.f32 %v3473_v35, %v4267_v14  ;;  %3488 = vrcp.f32 %v939_v32 }
 0x3f2   :  { %v601_v6 = vpack.c.bf16 %v589_v46, %v588_v13  ;;  %3490 = vrcp.f32 %v936_v54 }
 0x3f3   :  { %v3475_v57 = vpop.eup %3474 }
 0x3f4   :  { %3050 = vmatprep.mubr.msk.bf16.mxu1 %vm313_vm9, %v601_v6  ;;  %v3477_v44 = vpop.eup %3476  ;;  %v399_v39 = vmul.f32 %v3475_v57, %v4310_v3 }
 0x3f5   :  { %3051 = vmatmul.mubr.msk.bf16.gmra.mrb[20].mxu1 %vm313_vm9, %v602_v53  ;;  %v3479_v59 = vpop.eup %3478  ;;  %v396_v16 = vmul.f32 %v3477_v44, %v4234_v10 }
 0x3f6   :  { %3062 = vmatprep.mubr.msk.bf16.mxu1 %vm313_vm9, %v409_v1  ;;  %v398_v63 = vmul.f32 %v3479_v59, %v4287_v12  ;;  %v3481_v47 = vpop.eup %3480 }
 0x3f7   :  { %v410_v40 = vpack.c.bf16 %v397_v58, %v396_v16  ;;  %v3483_v26 = vpop.eup %3482  ;;  %v401_v51 = vmul.f32 %v3481_v47, %v4295_v49 }
 0x3f8   :  { %v411_v5 = vpack.c.bf16 %v399_v39, %v398_v63  ;;  %v3485_v14 = vpop.eup %3484  ;;  %v961_v12 = vmul.f32 %v3483_v26, %v4318_v50  ;;  %v942_v50 = vpop.xlane.xlu1 %941 }
 0x3f9   :  { %v3487_v10 = vpop.eup %3486  ;;  %v400_v3 = vmul.f32 %v3485_v14, %v4271_v21  ;;  %v3645_v14 = vld [vmem:[#allocation6 + $0x8] sm:$0xff]  }
 0x3fa   :  { %v960_v34 = vmul.f32 %v3487_v10, %v4306_v43  ;;  %v948_v43 = vpop.xlane.xlu0 %947  ;;  %v1372_v10 = vld [vmem:[#allocation2 + $0x48] sm:$0xff] }
 0x3fb   :  { %1280 = vrot.lane.b32.xlu0 %v1265_v7, %s3753_s0  ;;  %v412_v4 = vpack.c.bf16 %v401_v51, %v400_v3  ;;  %v3489_v54 = vpop.eup %3488  ;;  %v3644_v7 = vld [vmem:[#allocation6] sm:$0xff]  }
 0x3fc   :  { %v3491_v60 = vpop.eup %3490  ;;  %v963_v49 = vmul.f32 %v3489_v54, %v4314_v55  ;;  %v1374_v54 = vld [vmem:[#allocation2 + $0x58] sm:$0xff] }
 0x3fd   :  { %3063 = vmatmul.mubr.msk.bf16.vlgmr.msra.gmra.mrb[16].mxu1 %vm313_vm9, %v410_v40 }
 0x3fe   :  { %3087 = vmatpush3.bf16.msra.mxu1 %v4074_v38  ;;  %3066 = vmatprep.mubr.msk.bf16.mxu1 %vm313_vm9, %v411_v5  ;;  %v975_v38 = vpack.c.bf16 %v961_v12, %v960_v34 }
 0x3ff   :  { %3088 = vmatprep.subr.bf16.mxu1 %v4072_v37 }
 0x402   :  { %3089 = vmatpush3.bf16.msra.mxu1 %v4072_v37  ;;  %v962_v37 = vmul.f32 %v3491_v60, %v4298_v41  ;;  %v1376_v60 = vld [vmem:[#allocation2 + $0x68] sm:$0xff] }
 0x403   :  { %3090 = vmatprep.subr.bf16.mxu1 %v4338_v25 }
 0x404   :  { %v976_v21 = vpack.c.bf16 %v963_v49, %v962_v37 }
 0x405   :  { %3067 = vmatmul.mubr.msk.bf16.gmra.mrb[20].mxu1 %vm313_vm9, %v412_v4 }
 0x406   :  { %3091 = vmatpush3.bf16.msra.mxu1 %v4338_v25  ;;  %3094 = vmatprep.mubr.msk.bf16.mxu1 %vm313_vm9, %v975_v38  ;;  %v1375_v38 = vld [vmem:[#allocation2 + $0x60] sm:$0xff] }
 0x407   :  { %3092 = vmatprep.subr.bf16.mxu1 %v4332_v48 }
 0x40a   :  { %3093 = vmatpush3.bf16.msra.mxu1 %v4332_v48 }
 0x40b   :  { %3118 = vmatprep.subr.bf16.mxu1 %v4334_v18 }
 0x40d   :  { %3095 = vmatmul.mubr.msk.bf16.vlgmr.msra.gmra.mrb[16].mxu1 %vm313_vm9, %v976_v21 }
 0x40e   :  { %3119 = vmatpush3.bf16.msra.mxu1 %v4334_v18 }
 0x421   :  { %v951_v25 = vpop.xlane.xlu0 %950 }
 0x422   :  { %3492 = vrcp.f32 %v951_v25 }
 0x423   :  { %3494 = vrcp.f32 %v942_v50 }
 0x424   :  { %3496 = vrcp.f32 %v948_v43 }
 0x425   :  { %v945_v55 = vpop.xlane.xlu0 %944 }
 0x426   :  { %3498 = vrcp.f32 %v945_v55 }
 0x429   :  { %v1227_v52 = vpop.xlane.xlu1 %1226 }
 0x42c   :  { %v3493_v33 = vpop.eup %3492 }
 0x42d   :  { %v1221_v41 = vpop.xlane.xlu1 %1220  ;;  %v3495_v9 = vpop.eup %3494  ;;  %v967_v22 = vmul.f32 %v3493_v33, %v4342_v56 }
 0x42e   :  { %v3497_v48 = vpop.eup %3496  ;;  %v964_v46 = vmul.f32 %v3495_v9, %v4322_v11  ;;  %3500 = vrcp.f32 %v1221_v41 }
 0x42f   :  { %v966_v29 = vmul.f32 %v3497_v48, %v4326_v2 }
 0x430   :  { %v3499_v19 = vpop.eup %3498 }
 0x431   :  { %v1230_v13 = vpop.xlane.xlu1 %1229  ;;  %v965_v18 = vmul.f32 %v3499_v19, %v4348_v45  ;;  %v978_v36 = vpack.c.bf16 %v967_v22, %v966_v29  ;;  %v3646_v29 = vld [vmem:[#allocation4 + $0x10] sm:$0xff] }
 0x433   :  { %v977_v8 = vpack.c.bf16 %v965_v18, %v964_v46 }
 0x435   :  { %v1233_v6 = vpop.xlane.xlu1 %1232  ;;  %3098 = vmatprep.mubr.msk.bf16.mxu1 %vm313_vm9, %v977_v8  ;;  %v1224_v24 = vpop.xlane.xlu0 %1223 }
 0x436   :  { %3099 = vmatmul.mubr.msk.bf16.gmra.mrb[20].mxu1 %vm313_vm9, %v978_v36  ;;  %3502 = vrcp.f32 %v1224_v24  ;;  %v3647_v36 = vld [vmem:[#allocation4 + $0x18] sm:$0xff] }
 0x437   :  { %3504 = vrcp.f32 %v1230_v13 }
 0x438   :  { %v3501_v11 = vpop.eup %3500  ;;  %3506 = vrcp.f32 %v1227_v52 }
 0x439   :  { %v1277_v53 = vpop.permute.xlu1 %1276  ;;  %v1239_v35 = vpop.xlane.xlu0 %1238  ;;  %v1251_v2 = vmul.f32 %v3501_v11, %v4358_v17 }
 0x43a   :  { %3120 = vmatprep.subr.bf16.mxu1 %v1277_v53 }
 0x43b   :  { %3121 = vmatpush3.bf16.msra.mxu1 %v1277_v53  ;;  %v3648_v53 = vld [vmem:[#allocation4] sm:$0xff] }
 0x43d   :  { %v1279_v56 = vpop.permute.xlu0 %1278 }
 0x43e   :  { %3122 = vmatprep.subr.bf16.mxu1 %v1279_v56 }
 0x43f   :  { %3123 = vmatpush3.bf16.msra.mxu1 %v1279_v56  ;;  %v3649_v56 = vld [vmem:[#allocation4 + $0x8] sm:$0xff] }
 0x440   :  { %v3503_v45 = vpop.eup %3502 }
 0x441   :  { %v1252_v1 = vmul.f32 %v3503_v45, %v4368_v31  ;;  %v3505_v59 = vpop.eup %3504 }
 0x442   :  { %v3507_v32 = vpop.eup %3506  ;;  %v1254_v39 = vmul.f32 %v3505_v59, %v4362_v61  ;;  %v1371_v61 = vld [vmem:[#allocation2 + $0x40] sm:$0xff]  ;;  %v3650_v59 = vld [vmem:[#allocation4 + $0x30] sm:$0xff] }
 0x443   :  { %v1266_v57 = vpack.c.bf16 %v1252_v1, %v1251_v2  ;;  %v1253_v17 = vmul.f32 %v3507_v32, %v4353_v15  ;;  %v1379_v34 = vpack.c.bf16 %v1372_v10, %v1371_v61 }
 0x445   :  { %3126 = vmatprep.mubr.msk.bf16.mxu1 %vm313_vm9, %v1266_v57  ;;  %v1267_v31 = vpack.c.bf16 %v1254_v39, %v1253_v17  ;;  %v3651_v39 = vld [vmem:[#allocation4 + $0x20] sm:$0xff] }
 0x46e   :  { %v1242_v44 = vpop.xlane.xlu0 %1241 }
 0x46f   :  { %3508 = vrcp.f32 %v1242_v44 }
 0x470   :  { %3510 = vrcp.f32 %v1233_v6 }
 0x471   :  { %3512 = vrcp.f32 %v1239_v35 }
 0x472   :  { %v1236_v58 = vpop.xlane.xlu0 %1235 }
 0x473   :  { %3514 = vrcp.f32 %v1236_v58 }
 0x476   :  { %v1281_v16 = vpop.permute.xlu0 %1280 }
 0x477   :  { %3124 = vmatprep.subr.bf16.mxu1 %v1281_v16 }
 0x478   :  { %3125 = vmatpush3.bf16.msra.mxu1 %v1281_v16 }
 0x479   :  { %3134 = vmatprep.subr.bf16.mxu1 %v3644_v7  ;;  %v3509_v63 = vpop.eup %3508 }
 0x47a   :  { %v3511_v40 = vpop.eup %3510  ;;  %v1258_v26 = vmul.f32 %v3509_v63, %v4393_v62  ;;  %v1373_v62 = vld [vmem:[#allocation2 + $0x50] sm:$0xff] }
 0x47b   :  { %3127 = vmatmul.mubr.msk.bf16.vlgmr.msra.gmra.mrb[16].mxu1 %vm313_vm9, %v1267_v31  ;;  %v3513_v47 = vpop.eup %3512  ;;  %v1255_v15 = vmul.f32 %v3511_v40, %v4366_v20  ;;  %v1380_v49 = vpack.c.bf16 %v1374_v54, %v1373_v62  ;;  %v1381_v20 = vpack.c.bf16 %v1376_v60, %v1375_v38  ;;  %v3652_v31 = vld [vmem:[#allocation4 + $0x38] sm:$0xff]  ;;  %v3653_v40 = vld [vmem:[#allocation4 + $0x28] sm:$0xff] }
 0x47c   :  { %3135 = vmatpush3.bf16.msra.mxu1 %v3644_v7  ;;  %v1257_v12 = vmul.f32 %v3513_v47, %v4374_v23  ;;  %v1377_v23 = vld [vmem:[#allocation2 + $0x70] sm:$0xff] }
 0x47d   :  { %v3515_v5 = vpop.eup %3514  ;;  %3136 = vmatprep.subr.bf16.mxu1 %v3645_v14 }
 0x47e   :  { %v1256_v51 = vmul.f32 %v3515_v5, %v4398_v42  ;;  %v1269_v4 = vpack.c.bf16 %v1258_v26, %v1257_v12  ;;  %v1378_v42 = vld [vmem:[#allocation2 + $0x78] sm:$0xff] }
 0x47f   :  { %v1382_v37 = vpack.c.bf16 %v1378_v42, %v1377_v23 }
 0x480   :  { %v1268_v3 = vpack.c.bf16 %v1256_v51, %v1255_v15  ;;  %3137 = vmatpush3.bf16.msra.mxu1 %v3645_v14 }
 0x482   :  { %3130 = vmatprep.mubr.msk.bf16.mxu1 %vm313_vm9, %v1268_v3 }
 0x483   :  { %3131 = vmatmul.mubr.msk.bf16.gmra.mrb[20].mxu1 %vm313_vm9, %v1269_v4 }
 0x484   :  { %3138 = vmatprep.mubr.msk.bf16.mxu1 %vm116_vm0, %v1379_v34 }
 0x48b   :  { %3139 = vmatmul.mubr.msk.bf16.vlgmr.msra.gmra.mrb[24].mxu1 %vm116_vm0, %v1380_v49 }
 0x48c   :  { %3142 = vmatprep.mubr.msk.bf16.mxu1 %vm116_vm0, %v1381_v20 }
 0x493   :  { %3143 = vmatmul.mubr.msk.bf16.gmra.mrb[28].mxu1 %vm116_vm0, %v1382_v37 }
 0x54e   :  { %v4469_v21 = vpop.f32.mrb[16].mxu1 }
 0x54f   :  { %5158 = vst [vmem:[#allocation16_spill] sm:$0xff] %v4469_v21  ;;  %v4471_v43 = vpop.f32.mrb[17].mxu1 }
 0x550   :  { %5159 = vst [vmem:[#allocation17_spill] sm:$0xff] %v4471_v43  ;;  %v4473_v50 = vpop.f32.mrb[18].mxu1 }
 0x551   :  { %5160 = vst [vmem:[#allocation18_spill] sm:$0xff] %v4473_v50  ;;  %v4477_v55 = vpop.f32.mrb[19].mxu1 }
 0x556   :  { %v4481_v33 = vpop.f32.mrb[20].mxu1 }
 0x557   :  { %5161 = vst [vmem:[#allocation19_spill] sm:$0xff] %v4481_v33  ;;  %v4483_v41 = vpop.f32.mrb[21].mxu1 }
 0x558   :  { %5162 = vst [vmem:[#allocation20_spill] sm:$0xff] %v4483_v41  ;;  %v4485_v9 = vpop.f32.mrb[22].mxu1 }
 0x559   :  { %5163 = vst [vmem:[#allocation21_spill] sm:$0xff] %v4485_v9  ;;  %v4489_v19 = vpop.f32.mrb[23].mxu1 }
 0x55a   :  { %5164 = vst [vmem:[#allocation22_spill] sm:$0xff] %v4489_v19 }
 0x55e   :  { %v3140_v13 = vpop.f32.mrb[24].mxu1 }
 0x55f   :  { %v1429_v46 = vpop.f32.mrb[25].mxu1  ;;  %v1438_v8 = vadd.f32 %v3646_v29, %v3140_v13 }
 0x560   :  { %v3141_v18 = vpop.f32.mrb[26].mxu1  ;;  %v1430_v35 = vadd.f32 %v3648_v53, %v1429_v46 }
 0x561   :  { %v1441_v6 = vadd.f32 %v3647_v36, %v3141_v18  ;;  %v1432_v24 = vpop.f32.mrb[27].mxu1 }
 0x562   :  { %v1433_v11 = vadd.f32 %v3649_v56, %v1432_v24 }
 0x563   :  { %v4493_v45 = vpack.c.bf16 %v1441_v6, %v1438_v8 }
 0x564   :  { %v4495_v2 = vpack.c.bf16 %v1433_v11, %v1430_v35 }
 0x565   :  { %v1835_v14 = vsel %vm594_vm2, %v4493_v45, 0  ;;  %v1658_v34 = vsel %vm404_vm3, %v4493_v45, 0  ;;  %v2198_v62 = vsel %vm970_vm4, %v4493_v45, 0  ;;  %v1465_v36 = vsel %vm207_vm7, %v4493_v45, 0 }
 0x566   :  { %v3144_v1 = vpop.f32.mrb[28].mxu1  ;;  %1472 = vrot.lane.b32.xlu0 %v4495_v2, %s3757_s3  ;;  %v1464_v57 = vsel %vm207_vm7, %v4495_v2, 0  ;;  %v1665_v44 = vsel %vm422_vm8, %v4495_v2, 0  ;;  %v1834_v61 = vsel %vm594_vm2, %v4495_v2, 0  ;;  %v2197_v15 = vsel %vm970_vm4, %v4495_v2, 0 }
 0x567   :  { %v1454_v58 = vadd.f32 %v3650_v59, %v3144_v1  ;;  %v1445_v32 = vpop.f32.mrb[29].mxu1  ;;  %3154 = vmatprep.mubr.msk.bf16.mxu0 %vm116_vm0, %v1464_v57  ;;  %3170 = vmatprep.mubr.msk.bf16.mxu1 %vm116_vm0, %v1665_v44  ;;  %v1657_v12 = vsel %vm404_vm3, %v4495_v2, 0  ;;  %v1666_v6 = vsel %vm422_vm8, %v4493_v45, 0  ;;  %v2028_v59 = vsel %vm798_vm5, %v4495_v2, 0 }
 0x568   :  { %v1446_v16 = vadd.f32 %v3651_v39, %v1445_v32  ;;  %v3145_v17 = vpop.f32.mrb[30].mxu1  ;;  %v2029_v28 = vsel %vm798_vm5, %v4493_v45, 0 }
 0x569   :  { %v1457_v7 = vadd.f32 %v3652_v31, %v3145_v17  ;;  %v1448_v63 = vpop.f32.mrb[31].mxu1  ;;  %v2307_v17 = vsel %vm1089_vm6, %v4493_v45, 0 }
 0x56a   :  { %v1449_v47 = vadd.f32 %v3653_v40, %v1448_v63  ;;  %1474 = vrot.lane.b32.xlu0 %v4493_v45, %s3757_s3 }
 0x56b   :  { %v4509_v5 = vpack.c.bf16 %v1457_v7, %v1454_v58 }
 0x56c   :  { %v4511_v26 = vpack.c.bf16 %v1449_v47, %v1446_v16  ;;  %v2306_v16 = vsel %vm1089_vm6, %v4495_v2, 0 }
 0x56d   :  { %v1837_v3 = vsel %vm594_vm2, %v4509_v5, 0  ;;  %v1660_v38 = vsel %vm404_vm3, %v4509_v5, 0  ;;  %v2200_v60 = vsel %vm970_vm4, %v4509_v5, 0  ;;  %v1467_v1 = vsel %vm207_vm7, %v4509_v5, 0 }
 0x56e   :  { %1476 = vrot.lane.b32.xlu1 %v4511_v26, %s3757_s3  ;;  %1478 = vrot.lane.b32.xlu0 %v4509_v5, %s3757_s3  ;;  %v1836_v4 = vsel %vm594_vm2, %v4511_v26, 0  ;;  %v1659_v54 = vsel %vm404_vm3, %v4511_v26, 0  ;;  %v2199_v0 = vsel %vm970_vm4, %v4511_v26, 0  ;;  %v1466_v53 = vsel %vm207_vm7, %v4511_v26, 0 }
 0x56f   :  { %v1667_v35 = vsel %vm422_vm8, %v4511_v26, 0  ;;  %v1668_v57 = vsel %vm422_vm8, %v4509_v5, 0  ;;  %v2030_v58 = vsel %vm798_vm5, %v4511_v26, 0  ;;  %v2031_v32 = vsel %vm798_vm5, %v4509_v5, 0 }
 0x570   :  { %v2308_v31 = vsel %vm1089_vm6, %v4511_v26, 0  ;;  %v2309_v7 = vsel %vm1089_vm6, %v4509_v5, 0 }
 0x572   :  { %1848 = vrot.lane.b32.xlu1 %v1835_v14, %s3753_s0  ;;  %1846 = vrot.lane.b32.xlu0 %v1834_v61, %s3753_s0 }
 0x576   :  { %2209 = vrot.lane.b32.xlu0 %v2197_v15, %s3753_s0  ;;  %1939 = vrot.lane.b32.xlu1 %v1657_v12, %s3753_s0 }
 0x57a   :  { %1852 = vrot.lane.b32.xlu0 %v1837_v3, %s3753_s0  ;;  %1941 = vrot.lane.b32.xlu1 %v1658_v34, %s3753_s0 }
 0x57e   :  { %1850 = vrot.lane.b32.xlu0 %v1836_v4, %s3753_s0  ;;  %2211 = vrot.lane.b32.xlu1 %v2198_v62, %s3753_s0 }
 0x582   :  { %1943 = vrot.lane.b32.xlu0 %v1659_v54, %s3753_s0  ;;  %1945 = vrot.lane.b32.xlu1 %v1660_v38, %s3753_s0 }
 0x586   :  { %2213 = vrot.lane.b32.xlu0 %v2199_v0, %s3753_s0  ;;  %2215 = vrot.lane.b32.xlu1 %v2200_v60, %s3753_s0 }
 0x5d8   :  { %v1473_v49 = vpop.permute.xlu0 %1472 }
 0x5d9   :  { %3358 = vmatprep.subr.msk.bf16.mxu0 %vm116_vm0, %v1473_v49  ;;  %3362 = vmatprep.subr.msk.bf16.mxu1 %vm116_vm0, %v1473_v49  ;;  %v4568_v20 = vsel %vm116_vm0, %v1473_v49, 0 }
 0x5da   :  { %3147 = vmatpush3.bf16.xpose.msra.mxu0 %v4568_v20  ;;  %3163 = vmatpush3.bf16.xpose.msra.mxu1 %v4568_v20 }
 0x5dc   :  { %v1475_v23 = vpop.permute.xlu0 %1474 }
 0x5dd   :  { %3359 = vmatprep.subr.msk.bf16.mxu0 %vm116_vm0, %v1475_v23  ;;  %3363 = vmatprep.subr.msk.bf16.mxu1 %vm116_vm0, %v1475_v23  ;;  %v1496_v42 = vsel %vm116_vm0, %v1475_v23, 0 }
 0x5e0   :  { %v4575_v37 = vpop.permute.xlu1 %1476  ;;  %v1479_v13 = vpop.permute.xlu0 %1478 }
 0x5e1   :  { %v1499_v46 = vsel %vm116_vm0, %v4575_v37, 0  ;;  %v1502_v29 = vsel %vm116_vm0, %v1479_v13, 0 }
 0x5e2   :  { %3149 = vmatpush3.bf16.xpose.msra.mxu0 %v1496_v42  ;;  %3165 = vmatpush3.bf16.xpose.msra.mxu1 %v1496_v42 }
 0x5e3   :  { %3360 = vmatprep.subr.msk.bf16.mxu0 %vm116_vm0, %v4575_v37  ;;  %3364 = vmatprep.subr.msk.bf16.mxu1 %vm116_vm0, %v4575_v37 }
 0x5e4   :  { %v1847_v18 = vpop.permute.xlu0 %1846  ;;  %v1849_v56 = vpop.permute.xlu1 %1848 }
 0x5e8   :  { %v4586_v8 = vpop.permute.xlu0 %2209  ;;  %v4621_v27 = vpop.permute.xlu1 %1939 }
 0x5ea   :  { %3151 = vmatpush3.bf16.xpose.msra.mxu0 %v1499_v46  ;;  %3167 = vmatpush3.bf16.xpose.msra.mxu1 %v1499_v46 }
 0x5eb   :  { %3361 = vmatprep.subr.msk.bf16.mxu0 %vm116_vm0, %v1479_v13  ;;  %3365 = vmatprep.subr.msk.bf16.mxu1 %vm116_vm0, %v1479_v13 }
 0x5ec   :  { %v1853_v24 = vpop.permute.xlu0 %1852 }
 0x5f0   :  { %v1851_v11 = vpop.permute.xlu0 %1850 }
 0x5f2   :  { %3153 = vmatpush3.bf16.xpose.msra.mxu0 %v1502_v29  ;;  %3169 = vmatpush3.bf16.xpose.msra.mxu1 %v1502_v29 }
 0x5f3   :  { %3178 = vmatprep.subr.bf16.mxu0 %v1847_v18  ;;  %3366 = vmatprep.subr.msk.bf16.mxu1 %vm116_vm0, %v1473_v49 }
 0x5f9   :  { %3155 = vmatmul.mubr.msk.bf16.vlgmr.msra.gmra.mrb[24].mxu0 %vm116_vm0, %v1465_v36  ;;  %3171 = vmatmul.mubr.msk.bf16.vlgmr.msra.gmra.mrb[32].mxu1 %vm116_vm0, %v1666_v6 }
 0x5fa   :  { %3158 = vmatprep.mubr.msk.bf16.mxu0 %vm116_vm0, %v1466_v53  ;;  %3174 = vmatprep.mubr.msk.bf16.mxu1 %vm116_vm0, %v1667_v35 }
 0x5fb   :  { %3179 = vmatpush3.bf16.msra.mxu0 %v1847_v18  ;;  %3211 = vmatpush3.bf16.xpose.msra.mxu1 %v4568_v20 }
 0x5fc   :  { %3180 = vmatprep.subr.bf16.mxu0 %v1849_v56  ;;  %3367 = vmatprep.subr.msk.bf16.mxu1 %vm116_vm0, %v1475_v23 }
 0x5ff   :  { %3181 = vmatpush3.bf16.msra.mxu0 %v1849_v56 }
 0x600   :  { %3182 = vmatprep.subr.bf16.mxu0 %v1851_v11 }
 0x601   :  { %3159 = vmatmul.mubr.msk.bf16.gmra.mrb[28].mxu0 %vm116_vm0, %v1467_v1  ;;  %3175 = vmatmul.mubr.msk.bf16.gmra.mrb[36].mxu1 %vm116_vm0, %v1668_v57 }
 0x602   :  { %3218 = vmatprep.mubr.msk.bf16.mxu1 %vm116_vm0, %v2028_v59 }
 0x603   :  { %3183 = vmatpush3.bf16.msra.mxu0 %v1851_v11  ;;  %3213 = vmatpush3.bf16.xpose.msra.mxu1 %v1496_v42 }
 0x604   :  { %3184 = vmatprep.subr.bf16.mxu0 %v1853_v24  ;;  %3368 = vmatprep.subr.msk.bf16.mxu1 %vm116_vm0, %v4575_v37 }
 0x607   :  { %3185 = vmatpush3.bf16.msra.mxu0 %v1853_v24 }
 0x608   :  { %3194 = vmatprep.subr.bf16.mxu0 %v4621_v27 }
 0x60b   :  { %3215 = vmatpush3.bf16.xpose.msra.mxu1 %v1499_v46 }
 0x60c   :  { %3369 = vmatprep.subr.msk.bf16.mxu1 %vm116_vm0, %v1479_v13 }
 0x613   :  { %3217 = vmatpush3.bf16.xpose.msra.mxu1 %v1502_v29 }
 0x614   :  { %3370 = vmatprep.subr.msk.bf16.mxu1 %vm116_vm0, %v1473_v49 }
 0x61a   :  { %3219 = vmatmul.mubr.msk.bf16.vlgmr.msra.gmra.mrb[40].mxu1 %vm116_vm0, %v2029_v28 }
 0x61b   :  { %3222 = vmatprep.mubr.msk.bf16.mxu1 %vm116_vm0, %v2030_v58  ;;  %3243 = vmatpush3.bf16.xpose.msra.mxu1 %v4568_v20 }
 0x61c   :  { %3371 = vmatprep.subr.msk.bf16.mxu1 %vm116_vm0, %v1475_v23 }
 0x622   :  { %3223 = vmatmul.mubr.msk.bf16.gmra.mrb[44].mxu1 %vm116_vm0, %v2031_v32 }
 0x623   :  { %3245 = vmatpush3.bf16.xpose.msra.mxu1 %v1496_v42  ;;  %3250 = vmatprep.mubr.msk.bf16.mxu1 %vm116_vm0, %v2306_v16 }
 0x624   :  { %3372 = vmatprep.subr.msk.bf16.mxu1 %vm116_vm0, %v4575_v37 }
 0x62b   :  { %3247 = vmatpush3.bf16.xpose.msra.mxu1 %v1499_v46 }
 0x62c   :  { %3373 = vmatprep.subr.msk.bf16.mxu1 %vm116_vm0, %v1479_v13 }
 0x633   :  { %3249 = vmatpush3.bf16.xpose.msra.mxu1 %v1502_v29 }
 0x63a   :  { %3251 = vmatmul.mubr.msk.bf16.vlgmr.msra.gmra.mrb[48].mxu1 %vm116_vm0, %v2307_v17 }
 0x63b   :  { %3254 = vmatprep.mubr.msk.bf16.mxu1 %vm116_vm0, %v2308_v31 }
 0x642   :  { %3255 = vmatmul.mubr.msk.bf16.gmra.mrb[52].mxu1 %vm116_vm0, %v2309_v7 }
 0x6cc   :  { %v4659_v63 = vpop.f32.mrb[24].mxu0  ;;  %v4661_v40 = vpop.f32.mrb[32].mxu1 }
 0x6cd   :  { %v4663_v47 = vpop.f32.mrb[25].mxu0  ;;  %v4665_v14 = vpop.f32.mrb[33].mxu1  ;;  %v1752_v61 = vsel %vm313_vm9, %v4661_v40, -inf  ;;  %v1575_v34 = vsel %vm313_vm9, %v4659_v63, -inf }
 0x6ce   :  { %1753 = vmax.xlane.f32.xlu0 %v1752_v61  ;;  %v4669_v10 = vpop.f32.mrb[26].mxu0  ;;  %v4671_v15 = vpop.f32.mrb[34].mxu1  ;;  %v1746_v51 = vsel %vm313_vm9, %v4665_v14, -inf  ;;  %v1569_v60 = vsel %vm313_vm9, %v4663_v47, -inf }
 0x6cf   :  { %v4675_v12 = vpop.f32.mrb[35].mxu1  ;;  %1747 = vmax.xlane.f32.xlu1 %v1746_v51  ;;  %v4677_v3 = vpop.f32.mrb[27].mxu0  ;;  %v1755_v4 = vsel %vm313_vm9, %v4671_v15, -inf  ;;  %v1578_v23 = vsel %vm313_vm9, %v4669_v10, -inf }
 0x6d0   :  { %v1749_v13 = vsel %vm313_vm9, %v4675_v12, -inf  ;;  %v1572_v46 = vsel %vm313_vm9, %v4677_v3, -inf }
 0x6d2   :  { %1576 = vmax.xlane.f32.xlu0 %v1575_v34 }
 0x6d3   :  { %1756 = vmax.xlane.f32.xlu1 %v1755_v4 }
 0x6d4   :  { %v4683_v62 = vpop.f32.mrb[28].mxu0  ;;  %v4685_v54 = vpop.f32.mrb[36].mxu1 }
 0x6d5   :  { %v4687_v38 = vpop.f32.mrb[29].mxu0  ;;  %v4689_v0 = vpop.f32.mrb[37].mxu1  ;;  %v1764_v18 = vsel %vm313_vm9, %v4685_v54, -inf  ;;  %v1587_v36 = vsel %vm313_vm9, %v4683_v62, -inf }
 0x6d6   :  { %v4693_v49 = vpop.f32.mrb[38].mxu1  ;;  %1570 = vmax.xlane.f32.xlu0 %v1569_v60  ;;  %v4695_v20 = vpop.f32.mrb[30].mxu0  ;;  %v1758_v24 = vsel %vm313_vm9, %v4689_v0, -inf  ;;  %v1581_v35 = vsel %vm313_vm9, %v4687_v38, -inf }
 0x6d7   :  { %v4699_v42 = vpop.f32.mrb[39].mxu1  ;;  %1579 = vmax.xlane.f32.xlu1 %v1578_v23  ;;  %v4701_v37 = vpop.f32.mrb[31].mxu0  ;;  %v1767_v29 = vsel %vm313_vm9, %v4693_v49, -inf  ;;  %v1590_v6 = vsel %vm313_vm9, %v4695_v20, -inf }
 0x6d8   :  { %v1761_v53 = vsel %vm313_vm9, %v4699_v42, -inf  ;;  %v1584_v56 = vsel %vm313_vm9, %v4701_v37, -inf }
 0x6da   :  { %1750 = vmax.xlane.f32.xlu0 %v1749_v13 }
 0x6db   :  { %1573 = vmax.xlane.f32.xlu1 %v1572_v46 }
 0x6de   :  { %1765 = vmax.xlane.f32.xlu0 %v1764_v18 }
 0x6df   :  { %1768 = vmax.xlane.f32.xlu1 %v1767_v29 }
 0x6e2   :  { %1588 = vmax.xlane.f32.xlu0 %v1587_v36 }
 0x6e3   :  { %1591 = vmax.xlane.f32.xlu1 %v1590_v6 }
 0x6e6   :  { %1759 = vmax.xlane.f32.xlu0 %v1758_v24 }
 0x6e7   :  { %1762 = vmax.xlane.f32.xlu1 %v1761_v53 }
 0x6ea   :  { %1582 = vmax.xlane.f32.xlu0 %v1581_v35 }
 0x6eb   :  { %1585 = vmax.xlane.f32.xlu1 %v1584_v56 }
 0x6ed   :  { %v4723_v11 = vpop.f32.mrb[40].mxu1 }
 0x6ee   :  { %v4725_v1 = vpop.f32.mrb[41].mxu1  ;;  %v2115_v57 = vsel %vm313_vm9, %v4723_v11, -inf }
 0x6ef   :  { %v4729_v44 = vpop.f32.mrb[42].mxu1  ;;  %2116 = vmax.xlane.f32.xlu0 %v2115_v57  ;;  %v2109_v58 = vsel %vm313_vm9, %v4725_v1, -inf }
 0x6f0   :  { %v4731_v59 = vpop.f32.mrb[43].mxu1  ;;  %v2118_v28 = vsel %vm313_vm9, %v4729_v44, -inf }
 0x6f1   :  { %2119 = vmax.xlane.f32.xlu1 %v2118_v28  ;;  %v2112_v32 = vsel %vm313_vm9, %v4731_v59, -inf }
 0x6f3   :  { %2110 = vmax.xlane.f32.xlu0 %v2109_v58 }
 0x6f5   :  { %v4739_v39 = vpop.f32.mrb[44].mxu1  ;;  %2113 = vmax.xlane.f32.xlu1 %v2112_v32  ;;  %v2476_v32 = vsel %vm1261_vm10, %v4493_v45, 0 }
 0x6f6   :  { %v4741_v16 = vpop.f32.mrb[45].mxu1  ;;  %v2127_v17 = vsel %vm313_vm9, %v4739_v39, -inf }
 0x6f7   :  { %v4745_v31 = vpop.f32.mrb[46].mxu1  ;;  %2128 = vmax.xlane.f32.xlu0 %v2127_v17  ;;  %v2121_v51 = vsel %vm313_vm9, %v4741_v16, -inf  ;;  %v2475_v17 = vsel %vm1261_vm10, %v4495_v2, 0 }
 0x6f8   :  { %v4747_v7 = vpop.f32.mrb[47].mxu1  ;;  %v2130_v61 = vsel %vm313_vm9, %v4745_v31, -inf }
 0x6f9   :  { %2131 = vmax.xlane.f32.xlu1 %v2130_v61  ;;  %v2124_v34 = vsel %vm313_vm9, %v4747_v7, -inf  ;;  %v4795_v61 = vpop.permute.xlu1 %1941 }
 0x6fb   :  { %2122 = vmax.xlane.f32.xlu0 %v2121_v51 }
 0x6fd   :  { %2125 = vmax.xlane.f32.xlu1 %v2124_v34  ;;  %v4797_v51 = vpop.permute.xlu1 %2211  ;;  %v4799_v34 = vpop.permute.xlu0 %1943 }
 0x70d   :  { %v4755_v4 = vpop.f32.mrb[48].mxu1 }
 0x70e   :  { %v4757_v60 = vpop.f32.mrb[49].mxu1  ;;  %v2393_v23 = vsel %vm313_vm9, %v4755_v4, -inf }
 0x70f   :  { %v4761_v13 = vpop.f32.mrb[50].mxu1  ;;  %2394 = vmax.xlane.f32.xlu0 %v2393_v23  ;;  %v2387_v29 = vsel %vm313_vm9, %v4757_v60, -inf  ;;  %v4801_v23 = vpop.permute.xlu1 %1945 }
 0x710   :  { %v4763_v46 = vpop.f32.mrb[51].mxu1  ;;  %v2396_v18 = vsel %vm313_vm9, %v4761_v13, -inf }
 0x711   :  { %2397 = vmax.xlane.f32.xlu1 %v2396_v18  ;;  %v2390_v36 = vsel %vm313_vm9, %v4763_v46, -inf  ;;  %v4803_v18 = vpop.permute.xlu0 %2213 }
 0x713   :  { %2388 = vmax.xlane.f32.xlu0 %v2387_v29  ;;  %v4805_v29 = vpop.permute.xlu1 %2215 }
 0x715   :  { %v4771_v6 = vpop.f32.mrb[52].mxu1  ;;  %2391 = vmax.xlane.f32.xlu1 %v2390_v36 }
 0x716   :  { %v4773_v24 = vpop.f32.mrb[53].mxu1  ;;  %v2405_v53 = vsel %vm313_vm9, %v4771_v6, -inf }
 0x717   :  { %v4777_v35 = vpop.f32.mrb[54].mxu1  ;;  %2406 = vmax.xlane.f32.xlu0 %v2405_v53  ;;  %v2399_v28 = vsel %vm313_vm9, %v4773_v24, -inf }
 0x718   :  { %v4779_v56 = vpop.f32.mrb[55].mxu1  ;;  %v2408_v57 = vsel %vm313_vm9, %v4777_v35, -inf }
 0x719   :  { %2409 = vmax.xlane.f32.xlu1 %v2408_v57  ;;  %v2402_v58 = vsel %vm313_vm9, %v4779_v56, -inf }
 0x71b   :  { %2400 = vmax.xlane.f32.xlu0 %v2399_v28 }
 0x71d   :  { %2403 = vmax.xlane.f32.xlu1 %v2402_v58 }
 0x72e   :  { %2489 = vrot.lane.b32.xlu1 %v2476_v32, %s3753_s0 }
 0x731   :  { %2487 = vrot.lane.b32.xlu0 %v2475_v17, %s3753_s0 }
 0x75b   :  { %v1754_v45 = vpop.xlane.xlu0 %1753 }
 0x75c   :  { %v1772_v36 = vsub.f32 %v4661_v40, %v1754_v45  ;;  %v1748_v53 = vpop.xlane.xlu1 %1747 }
 0x75d   :  { %v1770_v2 = vsub.f32 %v4665_v14, %v1748_v53 }
 0x75e   :  { %v1782_v57 = vmul.f32 1.442695, %v1772_v36 }
 0x75f   :  { %v1778_v28 = vmul.f32 1.442695, %v1770_v2  ;;  %v1577_v58 = vpop.xlane.xlu0 %1576 }
 0x760   :  { %3516 = vpow2.f32 %v1782_v57  ;;  %v1595_v32 = vsub.f32 %v4659_v63, %v1577_v58  ;;  %v1757_v17 = vpop.xlane.xlu1 %1756 }
 0x761   :  { %3518 = vpow2.f32 %v1778_v28  ;;  %v1773_v22 = vsub.f32 %v4671_v15, %v1757_v17 }
 0x762   :  { %v1605_v48 = vmul.f32 1.442695, %v1595_v32 }
 0x763   :  { %v1571_v25 = vpop.xlane.xlu0 %1570  ;;  %v1784_v40 = vmul.f32 1.442695, %v1773_v22 }
 0x764   :  { %3520 = vpow2.f32 %v1605_v48  ;;  %v1593_v52 = vsub.f32 %v4663_v47, %v1571_v25  ;;  %v1580_v33 = vpop.xlane.xlu1 %1579 }
 0x765   :  { %v1596_v14 = vsub.f32 %v4669_v10, %v1580_v33 }
 0x766   :  { %v1601_v45 = vmul.f32 1.442695, %v1593_v52 }
 0x767   :  { %v1751_v36 = vpop.xlane.xlu0 %1750  ;;  %v1607_v63 = vmul.f32 1.442695, %v1596_v14 }
 0x768   :  { %3522 = vpow2.f32 %v1601_v45  ;;  %v1574_v53 = vpop.xlane.xlu1 %1573  ;;  %v1771_v57 = vsub.f32 %v4675_v12, %v1751_v36 }
 0x769   :  { %3524 = vpow2.f32 %v1784_v40  ;;  %v1594_v47 = vsub.f32 %v4677_v3, %v1574_v53 }
 0x76a   :  { %v4813_v2 = vpop.eup %3516  ;;  %3526 = vpow2.f32 %v1607_v63  ;;  %v1780_v22 = vmul.f32 1.442695, %v1771_v57 }
 0x76b   :  { %v1766_v28 = vpop.xlane.xlu0 %1765  ;;  %v1800_v48 = vsel %vm313_vm9, %v4813_v2, 0.0  ;;  %v4818_v15 = vpop.eup %3518  ;;  %v1603_v3 = vmul.f32 1.442695, %v1594_v47 }
 0x76c   :  { %v1776_v25 = vsub.f32 %v4685_v54, %v1766_v28  ;;  %v1769_v52 = vpop.xlane.xlu1 %1768  ;;  %1801 = vadd.xlane.f32.xlu0 %v1800_v48  ;;  %v1794_v12 = vsel %vm313_vm9, %v4818_v15, 0.0 }
 0x76d   :  { %v1777_v40 = vsub.f32 %v4693_v49, %v1769_v52 }
 0x76e   :  { %v4821_v33 = vpop.eup %3520  ;;  %v1790_v10 = vmul.f32 1.442695, %v1776_v25 }
 0x76f   :  { %v1589_v58 = vpop.xlane.xlu0 %1588  ;;  %v1623_v32 = vsel %vm313_vm9, %v4821_v33, 0.0  ;;  %v1792_v28 = vmul.f32 1.442695, %v1777_v40 }
 0x770   :  { %3528 = vpow2.f32 %v1790_v10  ;;  %v1599_v17 = vsub.f32 %v4683_v62, %v1589_v58  ;;  %1795 = vadd.xlane.f32.xlu0 %v1794_v12  ;;  %v1592_v54 = vpop.xlane.xlu1 %1591  ;;  %1624 = vadd.xlane.f32.xlu1 %v1623_v32 }
 0x771   :  { %3530 = vpow2.f32 %v1780_v22  ;;  %v1600_v48 = vsub.f32 %v4695_v20, %v1592_v54 }
 0x772   :  { %v4830_v45 = vpop.eup %3522  ;;  %v1613_v14 = vmul.f32 1.442695, %v1599_v17 }
 0x773   :  { %v1760_v36 = vpop.xlane.xlu0 %1759  ;;  %v1617_v53 = vsel %vm313_vm9, %v4830_v45, 0.0  ;;  %v4834_v63 = vpop.eup %3524  ;;  %v1615_v58 = vmul.f32 1.442695, %v1600_v48 }
 0x774   :  { %3532 = vpow2.f32 %v1613_v14  ;;  %v1774_v57 = vsub.f32 %v4689_v0, %v1760_v36  ;;  %v1763_v62 = vpop.xlane.xlu1 %1762  ;;  %1618 = vadd.xlane.f32.xlu1 %v1617_v53  ;;  %v1803_v22 = vsel %vm313_vm9, %v4834_v63, 0.0  ;;  %v4841_v47 = vpop.eup %3526 }
 0x775   :  { %3534 = vpow2.f32 %v1603_v3  ;;  %v1775_v25 = vsub.f32 %v4699_v42, %v1763_v62  ;;  %v1626_v54 = vsel %vm313_vm9, %v4841_v47, 0.0 }
 0x776   :  { %v1786_v49 = vmul.f32 1.442695, %v1774_v57 }
 0x777   :  { %v1583_v52 = vpop.xlane.xlu0 %1582  ;;  %v1788_v32 = vmul.f32 1.442695, %v1775_v25 }
 0x778   :  { %3536 = vpow2.f32 %v1786_v49  ;;  %v1597_v10 = vsub.f32 %v4687_v38, %v1583_v52  ;;  %1804 = vadd.xlane.f32.xlu1 %v1803_v22  ;;  %v1586_v0 = vpop.xlane.xlu1 %1585 }
 0x779   :  { %3538 = vpow2.f32 %v1792_v28  ;;  %v1598_v12 = vsub.f32 %v4701_v37, %v1586_v0 }
 0x77a   :  { %v4845_v20 = vpop.eup %3528  ;;  %v1609_v17 = vmul.f32 1.442695, %v1597_v10 }
 0x77b   :  { %v1812_v42 = vsel %vm313_vm9, %v4845_v20, 0.0  ;;  %v4851_v40 = vpop.eup %3530  ;;  %v1611_v3 = vmul.f32 1.442695, %v1598_v12 }
 0x77c   :  { %3540 = vpow2.f32 %v1609_v17  ;;  %v2117_v38 = vpop.xlane.xlu0 %2116  ;;  %1813 = vadd.xlane.f32.xlu0 %v1812_v42  ;;  %1627 = vadd.xlane.f32.xlu1 %v1626_v54  ;;  %v1797_v62 = vsel %vm313_vm9, %v4851_v40, 0.0 }
 0x77d   :  { %3542 = vpow2.f32 %v1615_v58  ;;  %v2135_v37 = vsub.f32 %v4723_v11, %v2117_v38 }
 0x77e   :  { %v4854_v14 = vpop.eup %3532  ;;  %3544 = vpow2.f32 %v1788_v32  ;;  %v2120_v36 = vpop.xlane.xlu1 %2119 }
 0x77f   :  { %v2145_v53 = vmul.f32 1.442695, %v2135_v37  ;;  %v1635_v57 = vsel %vm313_vm9, %v4854_v14, 0.0  ;;  %v4860_v28 = vpop.eup %3534  ;;  %3546 = vpow2.f32 %v1611_v3  ;;  %v2136_v49 = vsub.f32 %v4729_v44, %v2120_v36 }
 0x780   :  { %v2111_v48 = vpop.xlane.xlu0 %2110  ;;  %1636 = vadd.xlane.f32.xlu0 %v1635_v57  ;;  %1798 = vadd.xlane.f32.xlu1 %v1797_v62  ;;  %v1620_v12 = vsel %vm313_vm9, %v4860_v28, 0.0 }
 0x781   :  { %v2133_v11 = vsub.f32 %v4725_v1, %v2111_v48  ;;  %3548 = vpow2.f32 %v2145_v53  ;;  %v2147_v44 = vmul.f32 1.442695, %v2136_v49 }
 0x782   :  { %v4864_v25 = vpop.eup %3536  ;;  %v2114_v52 = vpop.xlane.xlu1 %2113 }
 0x783   :  { %v4866_v22 = vpop.eup %3538  ;;  %v2141_v10 = vmul.f32 1.442695, %v2133_v11  ;;  %v2134_v0 = vsub.f32 %v4731_v59, %v2114_v52  ;;  %v1806_v58 = vsel %vm313_vm9, %v4864_v25, 0.0 }
 0x784   :  { %v2129_v32 = vpop.xlane.xlu0 %2128  ;;  %1807 = vadd.xlane.f32.xlu0 %v1806_v58  ;;  %1621 = vadd.xlane.f32.xlu1 %v1620_v12  ;;  %v1815_v59 = vsel %vm313_vm9, %v4866_v22, 0.0 }
 0x785   :  { %v2143_v1 = vmul.f32 1.442695, %v2134_v0  ;;  %v2139_v17 = vsub.f32 %v4739_v39, %v2129_v32  ;;  %3550 = vpow2.f32 %v2141_v10 }
 0x786   :  { %v4874_v42 = vpop.eup %3540  ;;  %v2132_v54 = vpop.xlane.xlu1 %2131 }
 0x787   :  { %v4878_v38 = vpop.eup %3542  ;;  %3552 = vpow2.f32 %v2143_v1  ;;  %v2153_v3 = vmul.f32 1.442695, %v2139_v17  ;;  %v2140_v37 = vsub.f32 %v4745_v31, %v2132_v54  ;;  %v1629_v36 = vsel %vm313_vm9, %v4874_v42, 0.0 }
 0x788   :  { %v4883_v53 = vpop.eup %3544  ;;  %v2123_v57 = vpop.xlane.xlu0 %2122  ;;  %1630 = vadd.xlane.f32.xlu0 %v1629_v36  ;;  %1816 = vadd.xlane.f32.xlu1 %v1815_v59  ;;  %3554 = vpow2.f32 %v2147_v44  ;;  %v1638_v31 = vsel %vm313_vm9, %v4878_v38, 0.0 }
 0x789   :  { %v2155_v39 = vmul.f32 1.442695, %v2140_v37  ;;  %v2137_v62 = vsub.f32 %v4741_v16, %v2123_v57  ;;  %3556 = vpow2.f32 %v2153_v3  ;;  %v4886_v49 = vpop.eup %3546  ;;  %v1809_v10 = vsel %vm313_vm9, %v4883_v53, 0.0 }
 0x78a   :  { %v2126_v48 = vpop.xlane.xlu1 %2125  ;;  %v1632_v12 = vsel %vm313_vm9, %v4886_v49, 0.0 }
 0x78b   :  { %v2149_v11 = vmul.f32 1.442695, %v2137_v62  ;;  %v2138_v52 = vsub.f32 %v4747_v7, %v2126_v48  ;;  %v4893_v0 = vpop.eup %3548  ;;  %3558 = vpow2.f32 %v2155_v39 }
 0x78c   :  { %1639 = vadd.xlane.f32.xlu0 %v1638_v31  ;;  %1810 = vadd.xlane.f32.xlu1 %v1809_v10  ;;  %v2163_v58 = vsel %vm313_vm9, %v4893_v0, 0.0 }
 0x78d   :  { %3560 = vpow2.f32 %v2149_v11  ;;  %v2151_v16 = vmul.f32 1.442695, %v2138_v52 }
 0x78f   :  { %v4899_v7 = vpop.eup %3550  ;;  %3562 = vpow2.f32 %v2151_v16 }
 0x790   :  { %2164 = vadd.xlane.f32.xlu0 %v2163_v58  ;;  %1633 = vadd.xlane.f32.xlu1 %v1632_v12  ;;  %v2157_v1 = vsel %vm313_vm9, %v4899_v7, 0.0 }
 0x791   :  { %v4901_v32 = vpop.eup %3552 }
 0x792   :  { %v4903_v44 = vpop.eup %3554  ;;  %v2160_v17 = vsel %vm313_vm9, %v4901_v32, 0.0 }
 0x793   :  { %v4909_v54 = vpop.eup %3556  ;;  %v2166_v3 = vsel %vm313_vm9, %v4903_v44, 0.0 }
 0x794   :  { %2158 = vadd.xlane.f32.xlu0 %v2157_v1  ;;  %2161 = vadd.xlane.f32.xlu1 %v2160_v17  ;;  %v2175_v37 = vsel %vm313_vm9, %v4909_v54, 0.0 }
 0x795   :  { %v4911_v59 = vpop.eup %3558 }
 0x796   :  { %v2178_v39 = vsel %vm313_vm9, %v4911_v59, 0.0 }
 0x797   :  { %v4917_v36 = vpop.eup %3560 }
 0x798   :  { %2167 = vadd.xlane.f32.xlu0 %v2166_v3  ;;  %2176 = vadd.xlane.f32.xlu1 %v2175_v37  ;;  %v2169_v57 = vsel %vm313_vm9, %v4917_v36, 0.0 }
 0x799   :  { %v4923_v62 = vpop.eup %3562 }
 0x79a   :  { %v2172_v16 = vsel %vm313_vm9, %v4923_v62, 0.0 }
 0x79c   :  { %v2395_v48 = vpop.xlane.xlu0 %2394  ;;  %2170 = vadd.xlane.f32.xlu1 %v2169_v57  ;;  %2179 = vadd.xlane.f32.xlu0 %v2178_v39 }
 0x79d   :  { %v2413_v11 = vsub.f32 %v4755_v4, %v2395_v48 }
 0x79e   :  { %v2398_v52 = vpop.xlane.xlu1 %2397 }
 0x79f   :  { %v2423_v31 = vmul.f32 1.442695, %v2413_v11  ;;  %v2414_v10 = vsub.f32 %v4761_v13, %v2398_v52 }
 0x7a0   :  { %v2389_v58 = vpop.xlane.xlu0 %2388  ;;  %2173 = vadd.xlane.f32.xlu0 %v2172_v16 }
 0x7a1   :  { %3564 = vpow2.f32 %v2423_v31  ;;  %v2425_v12 = vmul.f32 1.442695, %v2414_v10  ;;  %v2411_v1 = vsub.f32 %v4757_v60, %v2389_v58 }
 0x7a2   :  { %v2392_v17 = vpop.xlane.xlu1 %2391 }
 0x7a3   :  { %3566 = vpow2.f32 %v2425_v12  ;;  %v2419_v3 = vmul.f32 1.442695, %v2411_v1  ;;  %v2412_v37 = vsub.f32 %v4763_v46, %v2392_v17 }
 0x7a4   :  { %v2407_v57 = vpop.xlane.xlu0 %2406 }
 0x7a5   :  { %3568 = vpow2.f32 %v2419_v3  ;;  %v2421_v4 = vmul.f32 1.442695, %v2412_v37  ;;  %v2417_v39 = vsub.f32 %v4771_v6, %v2407_v57 }
 0x7a6   :  { %v2410_v13 = vpop.xlane.xlu1 %2409 }
 0x7a7   :  { %3570 = vpow2.f32 %v2421_v4  ;;  %v2431_v48 = vmul.f32 1.442695, %v2417_v39  ;;  %v2418_v11 = vsub.f32 %v4777_v35, %v2410_v13 }
 0x7a8   :  { %v2401_v52 = vpop.xlane.xlu0 %2400 }
 0x7a9   :  { %3572 = vpow2.f32 %v2431_v48  ;;  %v2433_v31 = vmul.f32 1.442695, %v2418_v11  ;;  %v2415_v60 = vsub.f32 %v4773_v24, %v2401_v52 }
 0x7aa   :  { %v2404_v10 = vpop.xlane.xlu1 %2403 }
 0x7ab   :  { %v4934_v16 = vpop.eup %3564  ;;  %3574 = vpow2.f32 %v2433_v31  ;;  %v2427_v46 = vmul.f32 1.442695, %v2415_v60  ;;  %v2416_v58 = vsub.f32 %v4779_v56, %v2404_v10  ;;  %v2477_v31 = vsel %vm1261_vm10, %v4511_v26, 0 }
 0x7ac   :  { %v2441_v6 = vsel %vm313_vm9, %v4934_v16, 0.0  ;;  %v2478_v60 = vsel %vm1261_vm10, %v4509_v5, 0 }
 0x7ad   :  { %v4939_v12 = vpop.eup %3566  ;;  %3576 = vpow2.f32 %v2427_v46  ;;  %v2429_v1 = vmul.f32 1.442695, %v2416_v58  ;;  %2442 = vadd.xlane.f32.xlu1 %v2441_v6  ;;  %v4977_v46 = vpop.permute.xlu0 %2487 }
 0x7ae   :  { %v2444_v35 = vsel %vm313_vm9, %v4939_v12, 0.0  ;;  %v4975_v10 = vpop.permute.xlu1 %2489 }
 0x7af   :  { %v4943_v17 = vpop.eup %3568  ;;  %3578 = vpow2.f32 %v2429_v1  ;;  %2445 = vadd.xlane.f32.xlu0 %v2444_v35 }
 0x7b0   :  { %v2435_v24 = vsel %vm313_vm9, %v4943_v17, 0.0 }
 0x7b1   :  { %v4947_v3 = vpop.eup %3570  ;;  %2436 = vadd.xlane.f32.xlu1 %v2435_v24 }
 0x7b2   :  { %v2438_v56 = vsel %vm313_vm9, %v4947_v3, 0.0 }
 0x7b3   :  { %v4951_v37 = vpop.eup %3572  ;;  %2439 = vadd.xlane.f32.xlu0 %v2438_v56 }
 0x7b4   :  { %v2453_v57 = vsel %vm313_vm9, %v4951_v37, 0.0 }
 0x7b5   :  { %v4955_v4 = vpop.eup %3574  ;;  %2454 = vadd.xlane.f32.xlu1 %v2453_v57 }
 0x7b6   :  { %v2456_v39 = vsel %vm313_vm9, %v4955_v4, 0.0 }
 0x7b7   :  { %v4959_v13 = vpop.eup %3576  ;;  %2457 = vadd.xlane.f32.xlu0 %v2456_v39 }
 0x7b8   :  { %v2447_v48 = vsel %vm313_vm9, %v4959_v13, 0.0 }
 0x7b9   :  { %v4963_v11 = vpop.eup %3578  ;;  %2448 = vadd.xlane.f32.xlu1 %v2447_v48 }
 0x7ba   :  { %v2450_v52 = vsel %vm313_vm9, %v4963_v11, 0.0 }
 0x7bb   :  { %2451 = vadd.xlane.f32.xlu0 %v2450_v52 }
 0x7ca   :  { %2491 = vrot.lane.b32.xlu1 %v2477_v31, %s3753_s0 }
 0x7d1   :  { %2493 = vrot.lane.b32.xlu0 %v2478_v60, %s3753_s0 }
 0x7f9   :  { %v1802_v6 = vpop.xlane.xlu0 %1801 }
 0x7fd   :  { %v1625_v58 = vpop.xlane.xlu1 %1624  ;;  %v1796_v35 = vpop.xlane.xlu0 %1795 }
 0x801   :  { %v1619_v1 = vpop.xlane.xlu1 %1618 }
 0x805   :  { %v1805_v24 = vpop.xlane.xlu1 %1804 }
 0x806   :  { %3580 = vrcp.f32 %v1805_v24 }
 0x807   :  { %3582 = vrcp.f32 %v1796_v35 }
 0x808   :  { %3584 = vrcp.f32 %v1802_v6 }
 0x809   :  { %v1814_v56 = vpop.xlane.xlu0 %1813  ;;  %v1628_v57 = vpop.xlane.xlu1 %1627 }
 0x80d   :  { %v1637_v26 = vpop.xlane.xlu0 %1636  ;;  %v1799_v39 = vpop.xlane.xlu1 %1798 }
 0x80e   :  { %3586 = vrcp.f32 %v1799_v39 }
 0x80f   :  { %3588 = vrcp.f32 %v1619_v1 }
 0x810   :  { %v3581_v31 = vpop.eup %3580 }
 0x811   :  { %v1808_v30 = vpop.xlane.xlu0 %1807  ;;  %v1622_v5 = vpop.xlane.xlu1 %1621  ;;  %v1829_v19 = vmul.f32 %v3581_v31, %v4834_v63 }
 0x812   :  { %v3583_v60 = vpop.eup %3582  ;;  %3590 = vrcp.f32 %v1808_v30 }
 0x813   :  { %v3585_v9 = vpop.eup %3584  ;;  %v1826_v6 = vmul.f32 %v3583_v60, %v4818_v15 }
 0x814   :  { %v1828_v21 = vmul.f32 %v3585_v9, %v4813_v2 }
 0x815   :  { %v1631_v48 = vpop.xlane.xlu0 %1630  ;;  %v1817_v52 = vpop.xlane.xlu1 %1816 }
 0x816   :  { %3592 = vrcp.f32 %v1817_v52  ;;  %v1839_v1 = vpack.c.bf16 %v1829_v19, %v1828_v21 }
 0x817   :  { %3594 = vrcp.f32 %v1622_v5 }
 0x818   :  { %v3587_v41 = vpop.eup %3586  ;;  %3596 = vrcp.f32 %v1814_v56 }
 0x819   :  { %v1640_v24 = vpop.xlane.xlu0 %1639  ;;  %v1811_v35 = vpop.xlane.xlu1 %1810  ;;  %v1827_v39 = vmul.f32 %v3587_v41, %v4851_v40 }
 0x81a   :  { %3598 = vrcp.f32 %v1811_v35  ;;  %v3589_v63 = vpop.eup %3588 }
 0x81b   :  { %v1838_v50 = vpack.c.bf16 %v1827_v39, %v1826_v6  ;;  %3600 = vrcp.f32 %v1628_v57 }
 0x81c   :  { %v3591_v56 = vpop.eup %3590 }
 0x81d   :  { %v2165_v43 = vpop.xlane.xlu0 %2164  ;;  %3186 = vmatprep.mubr.msk.bf16.mxu0 %vm313_vm9, %v1838_v50  ;;  %v1634_v30 = vpop.xlane.xlu1 %1633 }
 0x81e   :  { %3187 = vmatmul.mubr.msk.bf16.vlgmr.msra.gmra.mrb[32].mxu0 %vm313_vm9, %v1839_v1  ;;  %3602 = vrcp.f32 %v1634_v30 }
 0x81f   :  { %3195 = vmatpush3.bf16.msra.mxu0 %v4621_v27  ;;  %3604 = vrcp.f32 %v1625_v58  ;;  %v1830_v27 = vmul.f32 %v3591_v56, %v4864_v25 }
 0x820   :  { %3196 = vmatprep.subr.bf16.mxu0 %v4795_v61  ;;  %v3593_v15 = vpop.eup %3592  ;;  %3606 = vrcp.f32 %v1631_v48 }
 0x821   :  { %v2159_v41 = vpop.xlane.xlu0 %2158  ;;  %v3595_v9 = vpop.eup %3594  ;;  %v1833_v40 = vmul.f32 %v3593_v15, %v4866_v22  ;;  %3608 = vrcp.f32 %v1640_v24 }
 0x822   :  { %v3597_v21 = vpop.eup %3596  ;;  %v2162_v19 = vpop.xlane.xlu1 %2161  ;;  %v1650_v5 = vmul.f32 %v3595_v9, %v4860_v28  ;;  %3610 = vrcp.f32 %v2159_v41 }
 0x823   :  { %3197 = vmatpush3.bf16.msra.mxu0 %v4795_v61  ;;  %v1832_v58 = vmul.f32 %v3597_v21, %v4845_v20  ;;  %v1649_v61 = vmul.f32 %v3589_v63, %v4830_v45  ;;  %3612 = vrcp.f32 %v2162_v19 }
 0x824   :  { %v3599_v50 = vpop.eup %3598  ;;  %3198 = vmatprep.subr.bf16.mxu0 %v4799_v34  ;;  %3614 = vrcp.f32 %v1637_v26 }
 0x825   :  { %v2168_v2 = vpop.xlane.xlu0 %2167  ;;  %v1831_v57 = vmul.f32 %v3599_v50, %v4883_v53  ;;  %v1841_v22 = vpack.c.bf16 %v1833_v40, %v1832_v58  ;;  %v3601_v31 = vpop.eup %3600  ;;  %v1661_v28 = vpack.c.bf16 %v1650_v5, %v1649_v61 }
 0x826   :  { %v2177_v25 = vpop.xlane.xlu1 %2176  ;;  %v1652_v45 = vmul.f32 %v3601_v31, %v4841_v47  ;;  %3616 = vrcp.f32 %v2168_v2 }
 0x827   :  { %3199 = vmatpush3.bf16.msra.mxu0 %v4799_v34  ;;  %v1840_v48 = vpack.c.bf16 %v1831_v57, %v1830_v27 }
 0x828   :  { %3200 = vmatprep.subr.bf16.mxu0 %v4801_v23  ;;  %v3603_v53 = vpop.eup %3602 }
 0x829   :  { %v2180_v52 = vpop.xlane.xlu0 %2179  ;;  %3190 = vmatprep.mubr.msk.bf16.mxu0 %vm313_vm9, %v1840_v48  ;;  %v3605_v20 = vpop.eup %3604  ;;  %v1654_v26 = vmul.f32 %v3603_v53, %v4886_v49 }
 0x82a   :  { %3191 = vmatmul.mubr.msk.bf16.gmra.mrb[36].mxu0 %vm313_vm9, %v1841_v22  ;;  %v3607_v34 = vpop.eup %3606  ;;  %v1651_v24 = vmul.f32 %v3605_v20, %v4821_v33  ;;  %v2171_v35 = vpop.xlane.xlu1 %2170 }
 0x82b   :  { %3201 = vmatpush3.bf16.msra.mxu0 %v4801_v23  ;;  %3202 = vmatprep.mubr.msk.bf16.mxu0 %vm313_vm9, %v1661_v28  ;;  %v1653_v6 = vmul.f32 %v3607_v34, %v4874_v42  ;;  %v3609_v39 = vpop.eup %3608 }
 0x82c   :  { %3226 = vmatprep.subr.bf16.mxu0 %v4586_v8  ;;  %v1662_v1 = vpack.c.bf16 %v1652_v45, %v1651_v24  ;;  %v3611_v23 = vpop.eup %3610  ;;  %v1656_v33 = vmul.f32 %v3609_v39, %v4878_v38  ;;  %v3387_v45 = vld [vmem:[#allocation7 + $0x8] sm:$0xff]   ;;  %v5169_v39 = vld [vmem:[#allocation17_spill] sm:$0xff] }
 0x82d   :  { %v2174_v60 = vpop.xlane.xlu0 %2173  ;;  %v1663_v30 = vpack.c.bf16 %v1654_v26, %v1653_v6  ;;  %v3613_v63 = vpop.eup %3612  ;;  %v2189_v42 = vmul.f32 %v3611_v23, %v4899_v7 }
 0x82e   :  { %3618 = vrcp.f32 %v2174_v60  ;;  %v3615_v47 = vpop.eup %3614  ;;  %v2190_v49 = vmul.f32 %v3613_v63, %v4901_v32 }
 0x82f   :  { %3620 = vrcp.f32 %v2165_v43  ;;  %v1655_v43 = vmul.f32 %v3615_v47, %v4854_v14  ;;  %v5178_v47 = vld [vmem:[#allocation19_spill] sm:$0xff] }
 0x830   :  { %3622 = vrcp.f32 %v2171_v35  ;;  %v3617_v41 = vpop.eup %3616  ;;  %v2201_v15 = vpack.c.bf16 %v2190_v49, %v2189_v42 }
 0x831   :  { %3624 = vrcp.f32 %v2180_v52  ;;  %v1664_v56 = vpack.c.bf16 %v1656_v33, %v1655_v43  ;;  %v2192_v32 = vmul.f32 %v3617_v41, %v4903_v44 }
 0x832   :  { %3203 = vmatmul.mubr.msk.bf16.vlgmr.msra.gmra.mrb[32].mxu0 %vm313_vm9, %v1662_v1  ;;  %3626 = vrcp.f32 %v2177_v25  ;;  %v3386_v25 = vld [vmem:[#allocation7] sm:$0xff]   ;;  %v5170_v1 = vpack.c.bf16 %v4477_v55, %v5169_v39 }
 0x833   :  { %3227 = vmatpush3.bf16.msra.mxu0 %v4586_v8  ;;  %3206 = vmatprep.mubr.msk.bf16.mxu0 %vm313_vm9, %v1663_v30  ;;  %v5175_v30 = vld [vmem:[#allocation20_spill] sm:$0xff] }
 0x834   :  { %3228 = vmatprep.subr.bf16.mxu0 %v4797_v51 }
 0x837   :  { %3229 = vmatpush3.bf16.msra.mxu0 %v4797_v51 }
 0x838   :  { %3230 = vmatprep.subr.bf16.mxu0 %v4803_v18  ;;  %v3619_v9 = vpop.eup %3618 }
 0x839   :  { %v3621_v38 = vpop.eup %3620  ;;  %v2194_v21 = vmul.f32 %v3619_v9, %v4923_v62 }
 0x83a   :  { %v2443_v8 = vpop.xlane.xlu1 %2442  ;;  %3207 = vmatmul.mubr.msk.bf16.gmra.mrb[36].mxu0 %vm313_vm9, %v1664_v56  ;;  %v3623_v14 = vpop.eup %3622  ;;  %v2191_v19 = vmul.f32 %v3621_v38, %v4893_v0 }
 0x83b   :  { %3231 = vmatpush3.bf16.msra.mxu0 %v4803_v18  ;;  %3234 = vmatprep.mubr.msk.bf16.mxu0 %vm313_vm9, %v2201_v15  ;;  %v2193_v18 = vmul.f32 %v3623_v14, %v4917_v36  ;;  %v3625_v40 = vpop.eup %3624 }
 0x83c   :  { %v2446_v7 = vpop.xlane.xlu0 %2445  ;;  %3232 = vmatprep.subr.bf16.mxu0 %v4805_v29  ;;  %v2202_v2 = vpack.c.bf16 %v2192_v32, %v2191_v19  ;;  %v3627_v62 = vpop.eup %3626  ;;  %v2833_v32 = vld [vmem:[%s5137_s4] ss:$0 sm:$0xff] }
 0x83d   :  { %v2203_v27 = vpack.c.bf16 %v2194_v21, %v2193_v18  ;;  %v2195_v57 = vmul.f32 %v3627_v62, %v4909_v54 }
 0x83e   :  { %v2437_v51 = vpop.xlane.xlu1 %2436 }
 0x83f   :  { %3628 = vrcp.f32 %v2437_v51  ;;  %3233 = vmatpush3.bf16.msra.mxu0 %v4805_v29  ;;  %v2196_v29 = vmul.f32 %v3625_v40, %v4911_v59 }
 0x840   :  { %3630 = vrcp.f32 %v2446_v7  ;;  %v2440_v50 = vpop.xlane.xlu0 %2439  ;;  %3258 = vmatprep.subr.bf16.mxu0 %v4977_v46 }
 0x841   :  { %3632 = vrcp.f32 %v2440_v50  ;;  %v2204_v48 = vpack.c.bf16 %v2196_v29, %v2195_v57 }
 0x842   :  { %3634 = vrcp.f32 %v2443_v8  ;;  %v2455_v44 = vpop.xlane.xlu1 %2454  ;;  %3235 = vmatmul.mubr.msk.bf16.vlgmr.msra.gmra.mrb[32].mxu0 %vm313_vm9, %v2202_v2 }
 0x843   :  { %3259 = vmatpush3.bf16.msra.mxu0 %v4977_v46  ;;  %3238 = vmatprep.mubr.msk.bf16.mxu0 %vm313_vm9, %v2203_v27 }
 0x844   :  { %v2458_v0 = vpop.xlane.xlu0 %2457  ;;  %3260 = vmatprep.subr.bf16.mxu0 %v4975_v10 }
 0x846   :  { %v2449_v36 = vpop.xlane.xlu1 %2448 }
 0x847   :  { %3636 = vrcp.f32 %v2449_v36  ;;  %3261 = vmatpush3.bf16.msra.mxu0 %v4975_v10 }
 0x848   :  { %3638 = vrcp.f32 %v2458_v0  ;;  %v2452_v5 = vpop.xlane.xlu0 %2451 }
 0x849   :  { %v3629_v58 = vpop.eup %3628  ;;  %3640 = vrcp.f32 %v2452_v5 }
 0x84a   :  { %v3631_v61 = vpop.eup %3630  ;;  %3642 = vrcp.f32 %v2455_v44  ;;  %v2492_v46 = vpop.permute.xlu1 %2491  ;;  %3239 = vmatmul.mubr.msk.bf16.gmra.mrb[36].mxu0 %vm313_vm9, %v2204_v48  ;;  %v2467_v31 = vmul.f32 %v3629_v58, %v4943_v17 }
 0x84b   :  { %v3633_v52 = vpop.eup %3632  ;;  %3262 = vmatprep.subr.bf16.mxu0 %v2492_v46  ;;  %v2470_v10 = vmul.f32 %v3631_v61, %v4939_v12 }
 0x84c   :  { %v3635_v22 = vpop.eup %3634  ;;  %v2494_v59 = vpop.permute.xlu0 %2493  ;;  %3263 = vmatpush3.bf16.msra.mxu0 %v2492_v46  ;;  %v2468_v54 = vmul.f32 %v3633_v52, %v4947_v3 }
 0x84d   :  { %3264 = vmatprep.subr.bf16.mxu0 %v2494_v59  ;;  %v2469_v53 = vmul.f32 %v3635_v22, %v4934_v16 }
 0x84e   :  { %v2479_v28 = vpack.c.bf16 %v2468_v54, %v2467_v31 }
 0x84f   :  { %v2480_v34 = vpack.c.bf16 %v2470_v10, %v2469_v53 }
 0x850   :  { %3265 = vmatpush3.bf16.msra.mxu0 %v2494_v59  ;;  %3266 = vmatprep.mubr.msk.bf16.mxu0 %vm313_vm9, %v2479_v28 }
 0x851   :  { %v3637_v20 = vpop.eup %3636  ;;  %3274 = vmatprep.subr.bf16.mxu0 %v3386_v25 }
 0x852   :  { %v3639_v60 = vpop.eup %3638  ;;  %v2471_v3 = vmul.f32 %v3637_v20, %v4959_v13  ;;  %v5171_v13 = vld [vmem:[#allocation18_spill] sm:$0xff] }
 0x853   :  { %v3641_v26 = vpop.eup %3640  ;;  %3267 = vmatmul.mubr.msk.bf16.vlgmr.msra.gmra.mrb[32].mxu0 %vm313_vm9, %v2480_v34  ;;  %v2474_v24 = vmul.f32 %v3639_v60, %v4955_v4  ;;  %v5174_v4 = vld [vmem:[#allocation22_spill] sm:$0xff] }
 0x854   :  { %v3643_v17 = vpop.eup %3642  ;;  %v2472_v12 = vmul.f32 %v3641_v26, %v4963_v11  ;;  %3275 = vmatpush3.bf16.msra.mxu0 %v3386_v25  ;;  %v5172_v11 = vld [vmem:[#allocation16_spill] sm:$0xff]  ;;  %v5176_v63 = vpack.c.bf16 %v5174_v4, %v5175_v30 }
 0x855   :  { %3276 = vmatprep.subr.bf16.mxu0 %v3387_v45  ;;  %v2473_v35 = vmul.f32 %v3643_v17, %v4951_v37  ;;  %v5173_v23 = vpack.c.bf16 %v5171_v13, %v5172_v11  ;;  %v5177_v37 = vld [vmem:[#allocation21_spill] sm:$0xff] }
 0x856   :  { %v2481_v16 = vpack.c.bf16 %v2472_v12, %v2471_v3  ;;  %v5179_v33 = vpack.c.bf16 %v5177_v37, %v5178_v47 }
 0x857   :  { %v2482_v6 = vpack.c.bf16 %v2474_v24, %v2473_v35 }
 0x858   :  { %3270 = vmatprep.mubr.msk.bf16.mxu0 %vm313_vm9, %v2481_v16  ;;  %3277 = vmatpush3.bf16.msra.mxu0 %v3387_v45 }
 0x85b   :  { %3271 = vmatmul.mubr.msk.bf16.gmra.mrb[36].mxu0 %vm313_vm9, %v2482_v6 }
 0x85c   :  { %3278 = vmatprep.mubr.msk.bf16.mxu0 %vm116_vm0, %v5170_v1 }
 0x863   :  { %3279 = vmatmul.mubr.msk.bf16.vlgmr.msra.gmra.mrb[40].mxu0 %vm116_vm0, %v5173_v23 }
 0x864   :  { %3282 = vmatprep.mubr.msk.bf16.mxu0 %vm116_vm0, %v5176_v63 }
 0x86b   :  { %3283 = vmatmul.mubr.msk.bf16.gmra.mrb[44].mxu0 %vm116_vm0, %v5179_v33 }
 0x926   :  { %v3268_v42 = vpop.f32.mrb[32].mxu0 }
 0x927   :  { %v2545_v49 = vpop.f32.mrb[33].mxu0 }
 0x928   :  { %v3269_v55 = vpop.f32.mrb[34].mxu0 }
 0x929   :  { %v2589_v43 = vpack.c.bf16 %v3269_v55, %v3268_v42  ;;  %v2548_v56 = vpop.f32.mrb[35].mxu0 }
 0x92a   :  { %v2588_v41 = vpack.c.bf16 %v2548_v56, %v2545_v49 }
 0x92c   :  { %3286 = vmatprep.mubr.msk.bf16.mxu0 %vm116_vm0, %v2588_v41 }
 0x92d   :  { %3287 = vmatmul.mubr.msk.bf16.gmra.mrb[48].mxu0 %vm116_vm0, %v2589_v43 }
 0x92e   :  { %v3272_v8 = vpop.f32.mrb[36].mxu0 }
 0x92f   :  { %v2561_v15 = vpop.f32.mrb[37].mxu0 }
 0x930   :  { %v3273_v9 = vpop.f32.mrb[38].mxu0 }
 0x931   :  { %v2591_v38 = vpack.c.bf16 %v3273_v9, %v3272_v8  ;;  %v2564_v7 = vpop.f32.mrb[39].mxu0 }
 0x932   :  { %v2590_v14 = vpack.c.bf16 %v2564_v7, %v2561_v15 }
 0x934   :  { %3290 = vmatprep.mubr.msk.bf16.mxu0 %vm116_vm0, %v2590_v14 }
 0x935   :  { %3291 = vmatmul.mubr.msk.bf16.gmra.mrb[52].mxu0 %vm116_vm0, %v2591_v38 }
 0x936   :  { %v3280_v51 = vpop.f32.mrb[40].mxu0 }
 0x937   :  { %v2682_v21 = vadd.f32 %v3280_v51, %v2833_v32  ;;  %v2673_v19 = vpop.f32.mrb[41].mxu0 }
 0x938   :  { %v2674_v50 = vadd.f32 %v2833_v32, %v2673_v19  ;;  %v3281_v18 = vpop.f32.mrb[42].mxu0 }
 0x939   :  { %2738 = vst.msk [vmem:[%s5138_s5 + $0x10] sm:$0xff] %vm116_vm0, %v2682_v21  ;;  %v2685_v2 = vadd.f32 %v3281_v18, %v2833_v32  ;;  %v2676_v40 = vpop.f32.mrb[43].mxu0 }
 0x93a   :  { %2736 = vst.msk [vmem:[%s5138_s5] sm:$0xff] %vm116_vm0, %v2674_v50  ;;  %v2677_v44 = vadd.f32 %v2833_v32, %v2676_v40 }
 0x93b   :  { %2739 = vst.msk [vmem:[%s5138_s5 + $0x18] sm:$0xff] %vm116_vm0, %v2685_v2 }
 0x93c   :  { %2737 = vst.msk [vmem:[%s5138_s5 + $0x8] sm:$0xff] %vm116_vm0, %v2677_v44 }
 0x93e   :  { %v3284_v27 = vpop.f32.mrb[44].mxu0 }
 0x93f   :  { %v2698_v62 = vadd.f32 %v3284_v27, %v2833_v32  ;;  %v2689_v0 = vpop.f32.mrb[45].mxu0 }
 0x940   :  { %v2690_v29 = vadd.f32 %v2833_v32, %v2689_v0  ;;  %v3285_v36 = vpop.f32.mrb[46].mxu0 }
 0x941   :  { %2742 = vst.msk [vmem:[%s5138_s5 + $0x30] sm:$0xff] %vm116_vm0, %v2698_v62  ;;  %v2701_v57 = vadd.f32 %v3285_v36, %v2833_v32  ;;  %v2692_v5 = vpop.f32.mrb[47].mxu0 }
 0x942   :  { %2740 = vst.msk [vmem:[%s5138_s5 + $0x20] sm:$0xff] %vm116_vm0, %v2690_v29  ;;  %v2693_v58 = vadd.f32 %v2833_v32, %v2692_v5 }
 0x943   :  { %2743 = vst.msk [vmem:[%s5138_s5 + $0x38] sm:$0xff] %vm116_vm0, %v2701_v57 }
 0x944   :  { %2741 = vst.msk [vmem:[%s5138_s5 + $0x28] sm:$0xff] %vm116_vm0, %v2693_v58 }
 0xa00   :  { %v3288_v48 = vpop.f32.mrb[48].mxu0 }
 0xa01   :  { %v2714_v61 = vadd.f32 %v3288_v48, %v2833_v32  ;;  %v2705_v46 = vpop.f32.mrb[49].mxu0 }
 0xa02   :  { %v2706_v52 = vadd.f32 %v2833_v32, %v2705_v46  ;;  %v3289_v22 = vpop.f32.mrb[50].mxu0 }
 0xa03   :  { %2746 = vst.msk [vmem:[%s5138_s5 + $0x50] sm:$0xff] %vm116_vm0, %v2714_v61  ;;  %v2717_v59 = vadd.f32 %v3289_v22, %v2833_v32  ;;  %v2708_v31 = vpop.f32.mrb[51].mxu0 }
 0xa04   :  { %2744 = vst.msk [vmem:[%s5138_s5 + $0x40] sm:$0xff] %vm116_vm0, %v2706_v52  ;;  %v2709_v54 = vadd.f32 %v2833_v32, %v2708_v31 }
 0xa05   :  { %2747 = vst.msk [vmem:[%s5138_s5 + $0x58] sm:$0xff] %vm116_vm0, %v2717_v59 }
 0xa06   :  { %2745 = vst.msk [vmem:[%s5138_s5 + $0x48] sm:$0xff] %vm116_vm0, %v2709_v54 }
 0xa08   :  { %v3292_v10 = vpop.f32.mrb[52].mxu0 }
 0xa09   :  { %v2730_v25 = vadd.f32 %v3292_v10, %v2833_v32  ;;  %v2721_v28 = vpop.f32.mrb[53].mxu0 }
 0xa0a   :  { %v2722_v53 = vadd.f32 %v2833_v32, %v2721_v28  ;;  %v3293_v20 = vpop.f32.mrb[54].mxu0 }
 0xa0b   :  { %2750 = vst.msk [vmem:[%s5138_s5 + $0x70] sm:$0xff] %vm116_vm0, %v2730_v25  ;;  %v2733_v34 = vadd.f32 %v3293_v20, %v2833_v32  ;;  %v2724_v45 = vpop.f32.mrb[55].mxu0 }
 0xa0c   :  { %2748 = vst.msk [vmem:[%s5138_s5 + $0x60] sm:$0xff] %vm116_vm0, %v2722_v53  ;;  %v2725_v60 = vadd.f32 %v2833_v32, %v2724_v45 }
 0xa0d   :  { %2751 = vst.msk [vmem:[%s5138_s5 + $0x78] sm:$0xff] %vm116_vm0, %v2733_v34 }
 0xa0e   :  { %2749 = vst.msk [vmem:[%s5138_s5 + $0x68] sm:$0xff] %vm116_vm0, %v2725_v60 }
 0xa0f   :  { %2756 = vsyncpa [#allocation3], 1 }
 0xa10   :  { %2757 = vsyncpa [#allocation5], 1 }
 0xa11   :  { %2758 = vsyncpa [#allocation8], 1 }

</bundles_post_ra>
